<compile_context>
chip_gen: v7x
topology: tpu7x:2x2x1
jax: 0.10.0
libtpu: 0.0.40
codegen_flags: <defaults>
</compile_context>

<pallas_src>
import functools

import jax
import jax.numpy as jnp
from jax.experimental import pallas as pl
from jax.experimental.pallas import tpu as pltpu

LANE = 128      # TPU lane width: feature / class dims are padded to this.
SUBLANE = 8


def _round_up(x, m):
    return (x + m - 1) // m * m


def _pad2d(a, rows, cols):
    return jnp.pad(a, ((0, rows - a.shape[0]), (0, cols - a.shape[1])))


def _device_vmem_bytes():
    """Physical VMEM per TensorCore (64 MiB on v7x, 128 MiB on v5e/v6e)."""
    try:
        return int(pltpu.get_tpu_info().vmem_capacity_bytes)
    except Exception:                       # noqa: BLE001 - conservative fallback
        return 64 << 20                     # safe lower bound across generations


# ---------------------------------------------------------------------------
# Fused kernel: conv1 + x.relu() + conv2 + global_mean_pool + final Linear.
# Single grid step; every operand is VMEM-resident, intermediates stay on-chip.
# All heavy matmuls: bf16 x bf16 -> f32 accumulation on the MXU.
# ---------------------------------------------------------------------------
def gin_fused_kernel(s_ref, x_ref, w1_ref, b1_ref, w2_ref, b2_ref,
                     onehot_ref, invc_ref, wl_ref, bl_ref, out_ref, *, feat):
    f = feat
    s = s_ref[...]                                                # (N, N) bf16

    # ---- conv1: agg = (I + A) @ x ; h = MLP(agg) ; outer x.relu() ----
    agg = jnp.dot(s, x_ref[...], preferred_element_type=jnp.float32)
    h = jnp.dot(agg.astype(jnp.bfloat16), w1_ref[:, :f],
                preferred_element_type=jnp.float32) + b1_ref[:, :f]
    h = jnp.maximum(h, 0.0)                                       # ReLU inside MLP
    h = jnp.dot(h.astype(jnp.bfloat16), w1_ref[:, f:],
                preferred_element_type=jnp.float32) + b1_ref[:, f:]
    h = jnp.maximum(h, 0.0)                                       # x.relu() after conv1

    # ---- conv2 ----
    agg = jnp.dot(s, h.astype(jnp.bfloat16), preferred_element_type=jnp.float32)
    h = jnp.dot(agg.astype(jnp.bfloat16), w2_ref[:, :f],
                preferred_element_type=jnp.float32) + b2_ref[:, :f]
    h = jnp.maximum(h, 0.0)
    h = jnp.dot(h.astype(jnp.bfloat16), w2_ref[:, f:],
                preferred_element_type=jnp.float32) + b2_ref[:, f:]

    # ---- global_mean_pool + final Linear (tiny -> keep f32 for accuracy) ----
    pooled = jnp.dot(onehot_ref[...], h.astype(jnp.bfloat16),
                     preferred_element_type=jnp.float32) * invc_ref[...]
    out_ref[...] = (jnp.dot(pooled, wl_ref[...],
                            preferred_element_type=jnp.float32) + bl_ref[...])


def gin_fused(s, x, w1, b1, w2, b2, onehot, inv_counts, wl, bl):
    n = s.shape[0]
    f = x.shape[1]
    g = onehot.shape[0]
    c = wl.shape[1]
    assert n % LANE == 0 and f % LANE == 0 and c % LANE == 0 and g % SUBLANE == 0

    # Working-set sizing (everything single-step resident; no pipelining needed).
    in_bytes = (n * n * 2 + n * f * 2                       # S, X (bf16)
                + 2 * (f * 2 * f * 2 + 2 * f * 4)           # packed W (bf16) + b (f32) x2
                + g * n * 2 + g * 4                         # one-hot (bf16), 1/count
                + f * c * 4 + c * 4)                        # final Linear W, b (f32)
    out_bytes = g * c * 4
    inter_bytes = 6 * n * f * 4                             # f32 intermediates (generous)
    vmem_cap = _device_vmem_bytes()
    vmem_limit = int(min(vmem_cap - (8 << 20),
                         max(16 << 20, 2 * (in_bytes + out_bytes) + inter_bytes)))
    assert 2 * (in_bytes + out_bytes) + inter_bytes <= vmem_limit, (
        "graph too large for fused VMEM-resident kernel; use the block-sparse "
        "path (see TODO)")

    flops = (4 * n * n * f          # two aggregations
             + 8 * n * f * f        # two 2-layer MLPs
             + 2 * g * n * f        # mean pool
             + 2 * g * f * c)       # final Linear
    bytes_accessed = in_bytes + out_bytes

    kernel = functools.partial(gin_fused_kernel, feat=f)
    return pl.pallas_call(
        kernel,
        out_shape=jax.ShapeDtypeStruct((g, c), jnp.float32),
        grid_spec=pltpu.PrefetchScalarGridSpec(
            num_scalar_prefetch=0,
            grid=(1,),
            in_specs=[
                pl.BlockSpec((n, n), lambda i: (0, 0)),        # S = I + A (bf16)
                pl.BlockSpec((n, f), lambda i: (0, 0)),        # X (bf16)
                pl.BlockSpec((f, 2 * f), lambda i: (0, 0)),    # packed W1 (bf16)
                pl.BlockSpec((1, 2 * f), lambda i: (0, 0)),    # packed b1 (f32)
                pl.BlockSpec((f, 2 * f), lambda i: (0, 0)),    # packed W2 (bf16)
                pl.BlockSpec((1, 2 * f), lambda i: (0, 0)),    # packed b2 (f32)
                pl.BlockSpec((g, n), lambda i: (0, 0)),        # graph one-hot (bf16)
                pl.BlockSpec((g, 1), lambda i: (0, 0)),        # 1/|graph| (f32)
                pl.BlockSpec((f, c), lambda i: (0, 0)),        # final Linear W (f32)
                pl.BlockSpec((1, c), lambda i: (0, 0)),        # final Linear b (f32)
            ],
            out_specs=pl.BlockSpec((g, c), lambda i: (0, 0)),
        ),
        compiler_params=pltpu.CompilerParams(
            dimension_semantics=("arbitrary",),
            vmem_limit_bytes=vmem_limit,
        ),
        cost_estimate=pl.CostEstimate(flops=flops, transcendentals=0,
                                      bytes_accessed=bytes_accessed),
    )(s, x, w1, b1, w2, b2, onehot, inv_counts, wl, bl)


# ---------------------------------------------------------------------------
# One-time per-graph-batch preprocessing (kept OUT of the per-forward path).
# ---------------------------------------------------------------------------
def build_graph_operators(edge_index, batch, num_nodes, num_graphs,
                          *, node_block=LANE):
    n_pad = _round_up(num_nodes, node_block)
    g_pad = _round_up(num_graphs, SUBLANE)

    src, dst = edge_index[0], edge_index[1]
    adj = jnp.zeros((n_pad, n_pad), jnp.float32).at[dst, src].add(1.0)
    # Small integer edge counts -> exact in bf16; halves the N^2 operand.
    s = (adj + jnp.eye(n_pad, dtype=jnp.float32)).astype(jnp.bfloat16)

    batch_p = jnp.full((n_pad,), -1, jnp.int32).at[:num_nodes].set(batch)
    member = batch_p[None, :] == jnp.arange(g_pad, dtype=jnp.int32)[:, None]
    counts = jnp.maximum(member.sum(axis=1, keepdims=True).astype(jnp.float32), 1.0)
    inv_counts = 1.0 / counts
    onehot = member.astype(jnp.bfloat16)        # exact 0/1
    return s, onehot, inv_counts, n_pad, g_pad


def pack_params(params, in_features, hidden, num_classes):
    """Zero-pad all feature dims to 128 lanes, pack each layer's two Linear
    weights/biases into single operands, store MLP weights in bf16 (MXU path);
    biases and the tiny final Linear stay f32."""
    (w1a, b1a, w1b, b1b, w2a, b2a, w2b, b2b, wl, bl) = params
    f = _round_up(max(in_features, hidden), LANE)
    c = _round_up(num_classes, LANE)
    w1 = jnp.concatenate([_pad2d(w1a, f, f), _pad2d(w1b, f, f)],
                         axis=1).astype(jnp.bfloat16)
    b1 = jnp.concatenate([_pad2d(b1a, 1, f), _pad2d(b1b, 1, f)], axis=1)
    w2 = jnp.concatenate([_pad2d(w2a, f, f), _pad2d(w2b, f, f)],
                         axis=1).astype(jnp.bfloat16)
    b2 = jnp.concatenate([_pad2d(b2a, 1, f), _pad2d(b2b, 1, f)], axis=1)
    return (w1, b1, w2, b2, _pad2d(wl, f, c), _pad2d(bl, 1, c)), f, c


@jax.jit
def gin_forward(x_pad, s, onehot, inv_counts, packed):
    w1, b1, w2, b2, wl, bl = packed
    return gin_fused(s, x_pad, w1, b1, w2, b2, onehot, inv_counts, wl, bl)


def init_linear(key, fan_in, fan_out):
    """Deterministic init mimicking torch.nn.Linear (uniform +-1/sqrt(fan_in))."""
    kw, kb = jax.random.split(key)
    bound = 1.0 / jnp.sqrt(jnp.float32(fan_in))
    w = jax.random.uniform(kw, (fan_in, fan_out), jnp.float32, -bound, bound)
    b = jax.random.uniform(kb, (1, fan_out), jnp.float32, -bound, bound)
    return w, b


if __name__ == "__main__":
    in_features = 8
    hidden_channels = 32
    num_classes = 4
    num_graphs = 16           # batch enough graphs that N fills the MXU M dim
    per_graph = 16
    num_nodes = num_graphs * per_graph    # 256

    key = jax.random.PRNGKey(0)
    k_x, k1a, k1b, k2a, k2b, kl = jax.random.split(key, 6)

    x = jax.random.normal(k_x, (num_nodes, in_features), jnp.float32)

    # Edge index: a directed ring (both directions) within each graph.
    edges = []
    for g in range(num_graphs):
        base = g * per_graph
        for i in range(per_graph):
            a = base + i
            b = base + (i + 1) % per_graph
            edges.append((a, b))
            edges.append((b, a))
    edge_index = jnp.array(edges, dtype=jnp.int32).T            # (2, E)
    batch = jnp.repeat(jnp.arange(num_graphs, dtype=jnp.int32), per_graph)

    w1a, b1a = init_linear(k1a, in_features, hidden_channels)
    w1b, b1b = init_linear(k1b, hidden_channels, hidden_channels)
    w2a, b2a = init_linear(k2a, hidden_channels, hidden_channels)
    w2b, b2b = init_linear(k2b, hidden_channels, hidden_channels)
    wl, bl = init_linear(kl, hidden_channels, num_classes)
    params = (w1a, b1a, w1b, b1b, w2a, b2a, w2b, b2b, wl, bl)

    # ---- one-time preprocessing per graph batch ----
    s, onehot, inv_counts, n_pad, g_pad = build_graph_operators(
        edge_index, batch, num_nodes, num_graphs)
    packed, f_pad, c_pad = pack_params(params, in_features, hidden_channels,
                                       num_classes)
    x_pad = _pad2d(x, n_pad, f_pad).astype(jnp.bfloat16)

    out_pad = jax.block_until_ready(
        gin_forward(x_pad, s, onehot, inv_counts, packed))
    out = out_pad[:num_graphs, :num_classes]

    # ---- plain-JAX f32 reference (dense, unpadded) ----
    adj_ref = jnp.zeros((num_nodes, num_nodes), jnp.float32).at[
        edge_index[1], edge_index[0]].add(1.0)
    s_ref = adj_ref + jnp.eye(num_nodes)
    h = jnp.maximum(s_ref @ x @ w1a + b1a, 0.0) @ w1b + b1b
    h = jnp.maximum(h, 0.0)
    h = jnp.maximum(s_ref @ h @ w2a + b2a, 0.0) @ w2b + b2b
    pool = (batch[None, :] == jnp.arange(num_graphs)[:, None]).astype(jnp.float32)
    pool = pool / jnp.maximum(pool.sum(axis=1, keepdims=True), 1.0)
    ref = pool @ h @ wl + bl

    assert out.shape == (num_graphs, num_classes)
    assert bool(jnp.all(jnp.isfinite(out)))
    assert bool(jnp.allclose(out, ref, rtol=1e-1, atol=1e-1)), \
        float(jnp.max(jnp.abs(out - ref)))
    print("KERNEL_OK")
</pallas_src>

<mosaic_0001>
module attributes {stable_mosaic.version = 11 : i64} {
  func.func @gin_fused_kernel(%arg0: i32, %arg1: memref<256x256xbf16, #tpu.memory_space<vmem>>, %arg2: memref<256x128xbf16, #tpu.memory_space<vmem>>, %arg3: memref<128x256xbf16, #tpu.memory_space<vmem>>, %arg4: memref<1x256xf32, #tpu.memory_space<vmem>>, %arg5: memref<128x256xbf16, #tpu.memory_space<vmem>>, %arg6: memref<1x256xf32, #tpu.memory_space<vmem>>, %arg7: memref<16x256xbf16, #tpu.memory_space<vmem>>, %arg8: memref<16x1xf32, #tpu.memory_space<vmem>>, %arg9: memref<128x128xf32, #tpu.memory_space<vmem>>, %arg10: memref<1x128xf32, #tpu.memory_space<vmem>>, %arg11: memref<16x128xf32, #tpu.memory_space<vmem>>) attributes {dimension_semantics = [#tpu.dimension_semantics<arbitrary>], iteration_bounds = array<i64: 1>, scalar_prefetch = 0 : i64, scratch_operands = 0 : i64, tpu.core_type = #tpu.core_type<tc>, window_params = [{pipeline_mode = #tpu.pipeline_mode<synchronous>, transform_indices = @transform_0, window_bounds = array<i64: 256, 256>}, {pipeline_mode = #tpu.pipeline_mode<synchronous>, transform_indices = @transform_1, window_bounds = array<i64: 256, 128>}, {pipeline_mode = #tpu.pipeline_mode<synchronous>, transform_indices = @transform_2, window_bounds = array<i64: 128, 256>}, {pipeline_mode = #tpu.pipeline_mode<synchronous>, transform_indices = @transform_3, window_bounds = array<i64: 1, 256>}, {pipeline_mode = #tpu.pipeline_mode<synchronous>, transform_indices = @transform_4, window_bounds = array<i64: 128, 256>}, {pipeline_mode = #tpu.pipeline_mode<synchronous>, transform_indices = @transform_5, window_bounds = array<i64: 1, 256>}, {pipeline_mode = #tpu.pipeline_mode<synchronous>, transform_indices = @transform_6, window_bounds = array<i64: 16, 256>}, {pipeline_mode = #tpu.pipeline_mode<synchronous>, transform_indices = @transform_7, window_bounds = array<i64: 16, 1>}, {pipeline_mode = #tpu.pipeline_mode<synchronous>, transform_indices = @transform_8, window_bounds = array<i64: 128, 128>}, {pipeline_mode = #tpu.pipeline_mode<synchronous>, transform_indices = @transform_9, window_bounds = array<i64: 1, 128>}, {pipeline_mode = #tpu.pipeline_mode<synchronous>, transform_indices = @transform_10, window_bounds = array<i64: 16, 128>}]} {
    %c0 = arith.constant 0 : index
    %c0_0 = arith.constant 0 : index
    %0 = vector.load %arg1[%c0, %c0_0] : memref<256x256xbf16, #tpu.memory_space<vmem>>, vector<256x256xbf16>
    %c0_1 = arith.constant 0 : index
    %c0_2 = arith.constant 0 : index
    %1 = vector.load %arg2[%c0_1, %c0_2] : memref<256x128xbf16, #tpu.memory_space<vmem>>, vector<256x128xbf16>
    %cst = arith.constant dense<0.000000e+00> : vector<256x128xf32>
    %2 = tpu.matmul %0, %1, %cst {dimension_numbers = #tpu.dot_dimension_numbers<[1], [0], [0], [1], [0, 0, 1, 1], [], []>} : vector<256x256xbf16>, vector<256x128xbf16>, vector<256x128xf32> -> vector<256x128xf32>
    %3 = arith.truncf %2 : vector<256x128xf32> to vector<256x128xbf16>
    %c0_3 = arith.constant 0 : index
    %c0_4 = arith.constant 0 : index
    %4 = vector.load %arg3[%c0_3, %c0_4] : memref<128x256xbf16, #tpu.memory_space<vmem>>, vector<128x128xbf16>
    %cst_5 = arith.constant dense<0.000000e+00> : vector<256x128xf32>
    %5 = tpu.matmul %3, %4, %cst_5 {dimension_numbers = #tpu.dot_dimension_numbers<[1], [0], [0], [1], [0, 0, 1, 1], [], []>} : vector<256x128xbf16>, vector<128x128xbf16>, vector<256x128xf32> -> vector<256x128xf32>
    %c0_6 = arith.constant 0 : index
    %c0_7 = arith.constant 0 : index
    %6 = vector.load %arg4[%c0_6, %c0_7] : memref<1x256xf32, #tpu.memory_space<vmem>>, vector<1x128xf32>
    %7 = vector.broadcast %6 : vector<1x128xf32> to vector<256x128xf32>
    %8 = arith.addf %5, %7 : vector<256x128xf32>
    %cst_8 = arith.constant 0.000000e+00 : f32
    %9 = vector.broadcast %cst_8 : f32 to vector<256x128xf32>
    %10 = arith.maximumf %8, %9 : vector<256x128xf32>
    %11 = arith.truncf %10 : vector<256x128xf32> to vector<256x128xbf16>
    %c0_9 = arith.constant 0 : index
    %c128 = arith.constant 128 : index
    %12 = vector.load %arg3[%c0_9, %c128] : memref<128x256xbf16, #tpu.memory_space<vmem>>, vector<128x128xbf16>
    %cst_10 = arith.constant dense<0.000000e+00> : vector<256x128xf32>
    %13 = tpu.matmul %11, %12, %cst_10 {dimension_numbers = #tpu.dot_dimension_numbers<[1], [0], [0], [1], [0, 0, 1, 1], [], []>} : vector<256x128xbf16>, vector<128x128xbf16>, vector<256x128xf32> -> vector<256x128xf32>
    %c0_11 = arith.constant 0 : index
    %c128_12 = arith.constant 128 : index
    %14 = vector.load %arg4[%c0_11, %c128_12] : memref<1x256xf32, #tpu.memory_space<vmem>>, vector<1x128xf32>
    %15 = vector.broadcast %14 : vector<1x128xf32> to vector<256x128xf32>
    %16 = arith.addf %13, %15 : vector<256x128xf32>
    %cst_13 = arith.constant 0.000000e+00 : f32
    %17 = vector.broadcast %cst_13 : f32 to vector<256x128xf32>
    %18 = arith.maximumf %16, %17 : vector<256x128xf32>
    %19 = arith.truncf %18 : vector<256x128xf32> to vector<256x128xbf16>
    %cst_14 = arith.constant dense<0.000000e+00> : vector<256x128xf32>
    %20 = tpu.matmul %0, %19, %cst_14 {dimension_numbers = #tpu.dot_dimension_numbers<[1], [0], [0], [1], [0, 0, 1, 1], [], []>} : vector<256x256xbf16>, vector<256x128xbf16>, vector<256x128xf32> -> vector<256x128xf32>
    %21 = arith.truncf %20 : vector<256x128xf32> to vector<256x128xbf16>
    %c0_15 = arith.constant 0 : index
    %c0_16 = arith.constant 0 : index
    %22 = vector.load %arg5[%c0_15, %c0_16] : memref<128x256xbf16, #tpu.memory_space<vmem>>, vector<128x128xbf16>
    %cst_17 = arith.constant dense<0.000000e+00> : vector<256x128xf32>
    %23 = tpu.matmul %21, %22, %cst_17 {dimension_numbers = #tpu.dot_dimension_numbers<[1], [0], [0], [1], [0, 0, 1, 1], [], []>} : vector<256x128xbf16>, vector<128x128xbf16>, vector<256x128xf32> -> vector<256x128xf32>
    %c0_18 = arith.constant 0 : index
    %c0_19 = arith.constant 0 : index
    %24 = vector.load %arg6[%c0_18, %c0_19] : memref<1x256xf32, #tpu.memory_space<vmem>>, vector<1x128xf32>
    %25 = vector.broadcast %24 : vector<1x128xf32> to vector<256x128xf32>
    %26 = arith.addf %23, %25 : vector<256x128xf32>
    %cst_20 = arith.constant 0.000000e+00 : f32
    %27 = vector.broadcast %cst_20 : f32 to vector<256x128xf32>
    %28 = arith.maximumf %26, %27 : vector<256x128xf32>
    %29 = arith.truncf %28 : vector<256x128xf32> to vector<256x128xbf16>
    %c0_21 = arith.constant 0 : index
    %c128_22 = arith.constant 128 : index
    %30 = vector.load %arg5[%c0_21, %c128_22] : memref<128x256xbf16, #tpu.memory_space<vmem>>, vector<128x128xbf16>
    %cst_23 = arith.constant dense<0.000000e+00> : vector<256x128xf32>
    %31 = tpu.matmul %29, %30, %cst_23 {dimension_numbers = #tpu.dot_dimension_numbers<[1], [0], [0], [1], [0, 0, 1, 1], [], []>} : vector<256x128xbf16>, vector<128x128xbf16>, vector<256x128xf32> -> vector<256x128xf32>
    %c0_24 = arith.constant 0 : index
    %c128_25 = arith.constant 128 : index
    %32 = vector.load %arg6[%c0_24, %c128_25] : memref<1x256xf32, #tpu.memory_space<vmem>>, vector<1x128xf32>
    %33 = vector.broadcast %32 : vector<1x128xf32> to vector<256x128xf32>
    %34 = arith.addf %31, %33 : vector<256x128xf32>
    %c0_26 = arith.constant 0 : index
    %c0_27 = arith.constant 0 : index
    %35 = vector.load %arg7[%c0_26, %c0_27] : memref<16x256xbf16, #tpu.memory_space<vmem>>, vector<16x256xbf16>
    %36 = arith.truncf %34 : vector<256x128xf32> to vector<256x128xbf16>
    %cst_28 = arith.constant dense<0.000000e+00> : vector<16x128xf32>
    %37 = tpu.matmul %35, %36, %cst_28 {dimension_numbers = #tpu.dot_dimension_numbers<[1], [0], [0], [1], [0, 0, 1, 1], [], []>} : vector<16x256xbf16>, vector<256x128xbf16>, vector<16x128xf32> -> vector<16x128xf32>
    %c0_29 = arith.constant 0 : index
    %c0_30 = arith.constant 0 : index
    %38 = vector.load %arg8[%c0_29, %c0_30] : memref<16x1xf32, #tpu.memory_space<vmem>>, vector<16x1xf32>
    %39 = vector.broadcast %38 : vector<16x1xf32> to vector<16x128xf32>
    %40 = arith.mulf %37, %39 : vector<16x128xf32>
    %c0_31 = arith.constant 0 : index
    %c0_32 = arith.constant 0 : index
    %41 = vector.load %arg9[%c0_31, %c0_32] : memref<128x128xf32, #tpu.memory_space<vmem>>, vector<128x128xf32>
    %cst_33 = arith.constant dense<0.000000e+00> : vector<16x128xf32>
    %42 = tpu.matmul %40, %41, %cst_33 {dimension_numbers = #tpu.dot_dimension_numbers<[1], [0], [0], [1], [0, 0, 1, 1], [], []>} : vector<16x128xf32>, vector<128x128xf32>, vector<16x128xf32> -> vector<16x128xf32>
    %c0_34 = arith.constant 0 : index
    %c0_35 = arith.constant 0 : index
    %43 = vector.load %arg10[%c0_34, %c0_35] : memref<1x128xf32, #tpu.memory_space<vmem>>, vector<1x128xf32>
    %44 = vector.broadcast %43 : vector<1x128xf32> to vector<16x128xf32>
    %45 = arith.addf %42, %44 : vector<16x128xf32>
    %c0_36 = arith.constant 0 : index
    %c0_37 = arith.constant 0 : index
    %46 = vector.load %arg11[%c0_36, %c0_37] : memref<16x128xf32, #tpu.memory_space<vmem>>, vector<16x128xf32>
    tpu.vector_store %arg11[%c0_36, %c0_37], %45 {strides = array<i32>} : memref<16x128xf32, #tpu.memory_space<vmem>>, vector<16x128xf32>,
    return
  }
  func.func @transform_0(%arg0: i32) -> (i32, i32) {
    %c0_i32 = arith.constant 0 : i32
    %c0_i32_0 = arith.constant 0 : i32
    %c0_i32_1 = arith.constant 0 : i32
    return %c0_i32, %c0_i32_0 : i32, i32
  }
  func.func @transform_1(%arg0: i32) -> (i32, i32) {
    %c0_i32 = arith.constant 0 : i32
    %c0_i32_0 = arith.constant 0 : i32
    %c0_i32_1 = arith.constant 0 : i32
    return %c0_i32, %c0_i32_0 : i32, i32
  }
  func.func @transform_2(%arg0: i32) -> (i32, i32) {
    %c0_i32 = arith.constant 0 : i32
    %c0_i32_0 = arith.constant 0 : i32
    %c0_i32_1 = arith.constant 0 : i32
    return %c0_i32, %c0_i32_0 : i32, i32
  }
  func.func @transform_3(%arg0: i32) -> (i32, i32) {
    %c0_i32 = arith.constant 0 : i32
    %c0_i32_0 = arith.constant 0 : i32
    %c0_i32_1 = arith.constant 0 : i32
    return %c0_i32, %c0_i32_0 : i32, i32
  }
  func.func @transform_4(%arg0: i32) -> (i32, i32) {
    %c0_i32 = arith.constant 0 : i32
    %c0_i32_0 = arith.constant 0 : i32
    %c0_i32_1 = arith.constant 0 : i32
    return %c0_i32, %c0_i32_0 : i32, i32
  }
  func.func @transform_5(%arg0: i32) -> (i32, i32) {
    %c0_i32 = arith.constant 0 : i32
    %c0_i32_0 = arith.constant 0 : i32
    %c0_i32_1 = arith.constant 0 : i32
    return %c0_i32, %c0_i32_0 : i32, i32
  }
  func.func @transform_6(%arg0: i32) -> (i32, i32) {
    %c0_i32 = arith.constant 0 : i32
    %c0_i32_0 = arith.constant 0 : i32
    %c0_i32_1 = arith.constant 0 : i32
    return %c0_i32, %c0_i32_0 : i32, i32
  }
  func.func @transform_7(%arg0: i32) -> (i32, i32) {
    %c0_i32 = arith.constant 0 : i32
    %c0_i32_0 = arith.constant 0 : i32
    %c0_i32_1 = arith.constant 0 : i32
    return %c0_i32, %c0_i32_0 : i32, i32
  }
  func.func @transform_8(%arg0: i32) -> (i32, i32) {
    %c0_i32 = arith.constant 0 : i32
    %c0_i32_0 = arith.constant 0 : i32
    %c0_i32_1 = arith.constant 0 : i32
    return %c0_i32, %c0_i32_0 : i32, i32
  }
  func.func @transform_9(%arg0: i32) -> (i32, i32) {
    %c0_i32 = arith.constant 0 : i32
    %c0_i32_0 = arith.constant 0 : i32
    %c0_i32_1 = arith.constant 0 : i32
    return %c0_i32, %c0_i32_0 : i32, i32
  }
  func.func @transform_10(%arg0: i32) -> (i32, i32) {
    %c0_i32 = arith.constant 0 : i32
    %c0_i32_0 = arith.constant 0 : i32
    %c0_i32_1 = arith.constant 0 : i32
    return %c0_i32, %c0_i32_0 : i32, i32
  }
}

</mosaic_0001>

<bundles_post_ra>
// kernel: gin_forward.1
= control target key start
LH: loop header
LB: loop body
LE: loop exit
PB: predicated region body
PF: predicated region fallthrough
CT: control target
= control target key end

     0   :  { %15 = vsyncpa [#allocation3], 0  ;;  %s3466_s0 = inlined_call_operand.hbm [shape: bf16[256,256], index: 0, kind: input, shape index: {}]   ;;  %s3467_s1 = inlined_call_operand.hbm [shape: bf16[256,128], index: 1, kind: input, shape index: {}]   ;;  %s3468_s2 = inlined_call_operand.hbm [shape: bf16[128,256], index: 2, kind: input, shape index: {}]   ;;  %s3469_s3 = inlined_call_operand.vmem [shape: f32[1,256], index: 3, kind: input, shape index: {}]   ;;  %s3470_s4 = inlined_call_operand.hbm [shape: bf16[128,256], index: 4, kind: input, shape index: {}]   ;;  %s3471_s5 = inlined_call_operand.vmem [shape: f32[1,256], index: 5, kind: input, shape index: {}]   ;;  %s3472_s6 = inlined_call_operand.vmem [shape: bf16[16,256], index: 6, kind: input, shape index: {}]   ;;  %s3473_s7 = inlined_call_operand.vmem [shape: f32[16,1], index: 7, kind: input, shape index: {}]   ;;  %s3474_s8 = inlined_call_operand.hbm [shape: f32[128,128], index: 8, kind: input, shape index: {}]   ;;  %s3475_s9 = inlined_call_operand.vmem [shape: f32[1,128], index: 9, kind: input, shape index: {}]   ;;  %s3476_s10 = inlined_call_operand.hbm [shape: f32[16,128], index: 10, kind: output, shape index: {}]  }
   0x1   :  { %16 = vsyncpa [#allocation6], 0 }
   0x2   :  { %17 = vsyncpa [#allocation9], 0 }
   0x3   :  { %18 = vsyncpa [#allocation4], 0  ;;  %s3018_s13 = smov [#allocation5]   ;;  %s2878_s17 = scalar_lea.hbm %s3467_s1, 2048 }
   0x4   :  { %s36_s14 = sshll.u32 %s3018_s13, 4  ;;  %p2879_p0 = scmp.ne.s32.totalorder %s3467_s1, %s2878_s17  ;;  %s37_s14 = int_to_ptr.vmem [resolvable:$true] %s36_s14 }
   0x5   :  { %p2882_p1 = scmp.lt.u32.totalorder %s2878_s17, %s3467_s1 }
   0x7   :  { %p2884_p2 = pnand %p2882_p1, %p2879_p0 }
   0x9   :  { %2887 = shalt.err (!%p2884_p2)
}
   0xa   :  { %s2888_s22 = scalar_lea.vmem %s37_s14, 2048  ;;  %p2893_p4 = scmp.lt.s32.totalorder %s37_s14, %s37_s14 }
   0xb   :  { %p2889_p3 = scmp.ne.s32.totalorder %s37_s14, %s2888_s22  ;;  %p2894_p5 = scmp.lt.s32.totalorder %s2888_s22, %s2888_s22 }
   0xd   :  { %p2895_p6 = por %p2894_p5, %p2893_p4 }
   0xf   :  { %p2896_p7 = pnand %p2895_p6, %p2889_p3 }
  0x11   :  { %2899 = shalt.err (!%p2896_p7)
}
  0x12   :  { %s3019_s23 = smov 64   ;;  %s3020_s24 = smov 4  }
  0x13   :  { %42 = dma.hbm_to_vmem [thread:$0]  %s3467_s1, 2048, %s37_s14, [#allocation6], %s3019_s23, %s3019_s23, %s3020_s24  }
  0x14   :  { %s3021_s27 = smov [#allocation8]   ;;  %s3022_s29 = smov [#allocation2]  }
  0x15   :  { %s62_s28 = sshll.u32 %s3021_s27, 4  ;;  %s24_s30 = sshll.u32 %s3022_s29, 4  ;;  %s63_s28 = int_to_ptr.vmem [resolvable:$true] %s62_s28  ;;  %s25_s30 = int_to_ptr.vmem [resolvable:$true] %s24_s30 }
  0x16   :  { %s2900_s13 = scalar_lea.hbm %s3470_s4, 2048 }
  0x17   :  { %p2901_p8 = scmp.ne.s32.totalorder %s3470_s4, %s2900_s13  ;;  %p2904_p9 = scmp.lt.u32.totalorder %s2900_s13, %s3470_s4 }
  0x19   :  { %p2906_p10 = pnand %p2904_p9, %p2901_p8 }
  0x1b   :  { %2909 = shalt.err (!%p2906_p10)
}
  0x1c   :  { %s2910_s1 = scalar_lea.vmem %s63_s28, 2048  ;;  %p2915_p12 = scmp.lt.s32.totalorder %s63_s28, %s63_s28 }
  0x1d   :  { %p2911_p11 = scmp.ne.s32.totalorder %s63_s28, %s2910_s1  ;;  %p2916_p13 = scmp.lt.s32.totalorder %s2910_s1, %s2910_s1 }
  0x1f   :  { %p2917_p0 = por %p2916_p13, %p2915_p12 }
  0x21   :  { %p2918_p1 = pnand %p2917_p0, %p2911_p11 }
  0x23   :  { %2921 = shalt.err (!%p2918_p1)
}
  0x24   :  { %s3023_s14 = smov 128   ;;  %s3024_s19 = smov 8  }
  0x25   :  { %68 = dma.hbm_to_vmem [thread:$0]  %s3470_s4, 2048, %s63_s28, [#allocation9], %s3023_s14, %s3023_s14, %s3024_s19  }
  0x26   :  { %s2922_s24 = scalar_lea.hbm %s3466_s0, 4096 }
  0x27   :  { %p2923_p2 = scmp.ne.s32.totalorder %s3466_s0, %s2922_s24  ;;  %p2926_p3 = scmp.lt.u32.totalorder %s2922_s24, %s3466_s0 }
  0x29   :  { %p2928_p4 = pnand %p2926_p3, %p2923_p2 }
  0x2b   :  { %2931 = shalt.err (!%p2928_p4)
}
  0x2c   :  { %s2932_s11 = scalar_lea.vmem %s25_s30, 4096  ;;  %p2937_p6 = scmp.lt.s32.totalorder %s25_s30, %s25_s30 }
  0x2d   :  { %p2933_p5 = scmp.ne.s32.totalorder %s25_s30, %s2932_s11  ;;  %p2938_p7 = scmp.lt.s32.totalorder %s2932_s11, %s2932_s11 }
  0x2f   :  { %p2939_p8 = por %p2938_p7, %p2937_p6 }
  0x31   :  { %p2940_p9 = pnand %p2939_p8, %p2933_p5 }
  0x33   :  { %2943 = shalt.err (!%p2940_p9)
}
  0x34   :  { %30 = dma.hbm_to_vmem [thread:$0]  %s3466_s0, 4096, %s25_s30, [#allocation3], %s3023_s14, %s3023_s14, %s3024_s19  }
  0x35   :  { %s3025_s12 = smov [#allocation7]   ;;  %s3026_s15 = smov [#allocation10]  }
  0x36   :  { %s48_s13 = sshll.u32 %s3025_s12, 4  ;;  %s80_s16 = sshll.u32 %s3026_s15, 4  ;;  %s49_s13 = int_to_ptr.vmem [resolvable:$true] %s48_s13  ;;  %s81_s16 = int_to_ptr.vmem [resolvable:$true] %s80_s16 }
  0x37   :  { %s2944_s1 = scalar_lea.hbm %s3468_s2, 2048 }
  0x38   :  { %p2945_p10 = scmp.ne.s32.totalorder %s3468_s2, %s2944_s1  ;;  %p2948_p11 = scmp.lt.u32.totalorder %s2944_s1, %s3468_s2 }
  0x3a   :  { %p2950_p12 = pnand %p2948_p11, %p2945_p10 }
  0x3c   :  { %2953 = shalt.err (!%p2950_p12)
}
  0x3d   :  { %s2954_s0 = scalar_lea.vmem %s49_s13, 2048  ;;  %p2959_p0 = scmp.lt.s32.totalorder %s49_s13, %s49_s13 }
  0x3e   :  { %p2955_p13 = scmp.ne.s32.totalorder %s49_s13, %s2954_s0  ;;  %p2960_p1 = scmp.lt.s32.totalorder %s2954_s0, %s2954_s0 }
  0x40   :  { %p2961_p2 = por %p2960_p1, %p2959_p0 }
  0x42   :  { %p2962_p3 = pnand %p2961_p2, %p2955_p13 }
  0x44   :  { %2965 = shalt.err (!%p2962_p3)
}
  0x45   :  { %54 = dma.hbm_to_vmem [thread:$0]  %s3468_s2, 2048, %s49_s13, [#allocation6], %s3023_s14, %s3023_s14, %s3024_s19  }
  0x46   :  { %s2966_s27 = scalar_lea.hbm %s3474_s8, 2048 }
  0x47   :  { %p2967_p4 = scmp.ne.s32.totalorder %s3474_s8, %s2966_s27  ;;  %p2970_p5 = scmp.lt.u32.totalorder %s2966_s27, %s3474_s8 }
  0x49   :  { %p2972_p6 = pnand %p2970_p5, %p2967_p4 }
  0x4b   :  { %2975 = shalt.err (!%p2972_p6)
}
  0x4c   :  { %s2976_s12 = scalar_lea.vmem %s81_s16, 2048  ;;  %p2981_p8 = scmp.lt.s32.totalorder %s81_s16, %s81_s16 }
  0x4d   :  { %p2977_p7 = scmp.ne.s32.totalorder %s81_s16, %s2976_s12  ;;  %p2982_p9 = scmp.lt.s32.totalorder %s2976_s12, %s2976_s12 }
  0x4f   :  { %p2983_p10 = por %p2982_p9, %p2981_p8 }
  0x51   :  { %p2984_p11 = pnand %p2983_p10, %p2977_p7 }
  0x53   :  { %2987 = shalt.err (!%p2984_p11)
}
  0x54   :  { %86 = dma.hbm_to_vmem [thread:$0]  %s3474_s8, 2048, %s81_s16, [#allocation9], %s3023_s14, %s3023_s14, %s3024_s19  }
  0x55   :  { %3010 = dma.done.wait [#allocation3], 4096  }
  0x56   :  { %3011 = vsyncadd [#allocation3], 4294963200 }
  0x57   :  { %3012 = dma.done.wait [#allocation6], 4096  }
  0x58   :  { %3013 = vsyncadd [#allocation6], 4294963200 }
  0x59   :  { %3014 = dma.done.wait [#allocation9], 4096  }
  0x5a   :  { %3015 = vsyncadd [#allocation9], 4294963200  ;;  %v2771_v0 = vld [vmem:[#allocation5 + $0x40] sm:$0xff]   ;;  %v2773_v2 = vld [vmem:[#allocation5 + $0x48] sm:$0xff]   ;;  %s3028_s26 = smov [#allocation11]  }
  0x5b   :  { %v2772_v1 = vld [vmem:[#allocation5] sm:$0xff]   ;;  %2140 = vmatprep.subr.bf16.mxu0 %v2771_v0  ;;  %v2774_v3 = vld [vmem:[#allocation5 + $0x8] sm:$0xff]   ;;  %v2775_v4 = vld [vmem:[#allocation5 + $0x50] sm:$0xff]   ;;  %s2039_s27 = sshll.u32 %s3028_s26, 4  ;;  %s2040_s27 = int_to_ptr.vmem [resolvable:$true] %s2039_s27 }
  0x5c   :  { %2141 = vmatpush3.bf16.msra.mxu0 %v2772_v1  ;;  %v2776_v5 = vld [vmem:[#allocation5 + $0x10] sm:$0xff]   ;;  %v2777_v6 = vld [vmem:[#allocation5 + $0x58] sm:$0xff]   ;;  %v2779_v8 = vld [vmem:[#allocation5 + $0x60] sm:$0xff]   ;;  %s2988_s29 = scalar_lea.vmem %s2040_s27, 256  ;;  %p2993_p13 = scmp.lt.s32.totalorder %s2040_s27, %s2040_s27 }
  0x5d   :  { %2142 = vmatprep.subr.bf16.mxu0 %v2773_v2  ;;  %v2778_v7 = vld [vmem:[#allocation5 + $0x18] sm:$0xff]   ;;  %v2780_v9 = vld [vmem:[#allocation5 + $0x20] sm:$0xff]   ;;  %v2781_v10 = vld [vmem:[#allocation5 + $0x68] sm:$0xff]   ;;  %p2989_p12 = scmp.ne.s32.totalorder %s2040_s27, %s2988_s29  ;;  %p2994_p0 = scmp.lt.s32.totalorder %s2988_s29, %s2988_s29 }
  0x5e   :  { %v3156_v11 = vld [vmem:[#allocation2 + $0x4] ss:$8 sps:$4 sm:$0xff]   ;;  %v2783_v13 = vld [vmem:[#allocation5 + $0x70] sm:$0xff]   ;;  %v2785_v15 = vld [vmem:[#allocation5 + $0x78] sm:$0xff]  }
  0x5f   :  { %v2782_v12 = vld [vmem:[#allocation5 + $0x28] sm:$0xff]   ;;  %457 = vmatprep.mubr.bf16.mxu0 %v3156_v11  ;;  %v2784_v14 = vld [vmem:[#allocation5 + $0x30] sm:$0xff]   ;;  %v2786_v16 = vld [vmem:[#allocation5 + $0x38] sm:$0xff]   ;;  %p2995_p1 = por %p2994_p0, %p2993_p13 }
  0x60   :  { %2143 = vmatpush3.bf16.msra.mxu0 %v2774_v3  ;;  %v2787_v17 = vld [vmem:[#allocation2] ss:$8 sps:$4 sm:$0xff]   ;;  %v2790_v18 = vld [vmem:[#allocation2 + $0x14] ss:$8 sps:$4 sm:$0xff]   ;;  %v2792_v19 = vld [vmem:[#allocation2 + $0x10] ss:$8 sps:$4 sm:$0xff]  }
  0x61   :  { %2144 = vmatprep.subr.bf16.mxu0 %v2775_v4  ;;  %v2793_v20 = vld [vmem:[#allocation2 + $0x24] ss:$8 sps:$4 sm:$0xff]   ;;  %v2835_v21 = vld [vmem:[#allocation7] ss:$8 sps:$4 sm:$0xff]   ;;  %v2836_v22 = vld [vmem:[#allocation7 + $0x10] ss:$8 sps:$4 sm:$0xff]   ;;  %p2996_p2 = pnand %p2995_p1, %p2989_p12 }
  0x62   :  { %2500 = vmatprep.subr.bf16.mxu1 %v2835_v21  ;;  %v2837_v23 = vld [vmem:[#allocation7 + $0x20] ss:$8 sps:$4 sm:$0xff]   ;;  %v2838_v25 = vld [vmem:[#allocation7 + $0x30] ss:$8 sps:$4 sm:$0xff]   ;;  %v2796_v26 = vld [vmem:[#allocation2 + $0x34] ss:$8 sps:$4 sm:$0xff]  }
  0x63   :  { %2501 = vmatpush3.bf16.msra.mxu1 %v2835_v21  ;;  %v2795_v24 = vld [vmem:[#allocation2 + $0x20] ss:$8 sps:$4 sm:$0xff]   ;;  %v2798_v27 = vld [vmem:[#allocation2 + $0x30] ss:$8 sps:$4 sm:$0xff]   ;;  %v2799_v28 = vld [vmem:[#allocation2 + $0x44] ss:$8 sps:$4 sm:$0xff]  }
  0x64   :  { %2145 = vmatpush3.bf16.msra.mxu0 %v2776_v5  ;;  %2502 = vmatprep.subr.bf16.mxu1 %v2836_v22  ;;  %v3159_v29 = vld [vmem:[#allocation2 + $0x40] ss:$8 sps:$4 sm:$0xff]   ;;  %v3161_v30 = vld [vmem:[#allocation2 + $0x54] ss:$8 sps:$4 sm:$0xff]   ;;  %v3165_v31 = vld [vmem:[#allocation2 + $0x50] ss:$8 sps:$4 sm:$0xff]  }
  0x65   :  { %2146 = vmatprep.subr.bf16.mxu0 %v2777_v6  ;;  %v3167_v32 = vld [vmem:[#allocation2 + $0x64] ss:$8 sps:$4 sm:$0xff]   ;;  %v3171_v33 = vld [vmem:[#allocation2 + $0x60] ss:$8 sps:$4 sm:$0xff]   ;;  %v3173_v34 = vld [vmem:[#allocation2 + $0x74] ss:$8 sps:$4 sm:$0xff]  }
  0x66   :  { %v3177_v35 = vld [vmem:[#allocation2 + $0x70] ss:$8 sps:$4 sm:$0xff]   ;;  %v3179_v36 = vld [vmem:[#allocation2 + $0x84] ss:$8 sps:$4 sm:$0xff]   ;;  %v3183_v37 = vld [vmem:[#allocation2 + $0x80] ss:$8 sps:$4 sm:$0xff]  }
  0x67   :  { %2503 = vmatpush3.bf16.msra.mxu1 %v2836_v22  ;;  %v3185_v38 = vld [vmem:[#allocation2 + $0x94] ss:$8 sps:$4 sm:$0xff]   ;;  %v3189_v39 = vld [vmem:[#allocation2 + $0x90] ss:$8 sps:$4 sm:$0xff]   ;;  %v3191_v40 = vld [vmem:[#allocation2 + $0xa4] ss:$8 sps:$4 sm:$0xff]  }
  0x68   :  { %2147 = vmatpush3.bf16.msra.mxu0 %v2778_v7  ;;  %2504 = vmatprep.subr.bf16.mxu1 %v2837_v23  ;;  %v3195_v41 = vld [vmem:[#allocation2 + $0xa0] ss:$8 sps:$4 sm:$0xff]   ;;  %v3197_v42 = vld [vmem:[#allocation2 + $0xb4] ss:$8 sps:$4 sm:$0xff]   ;;  %v3201_v44 = vld [vmem:[#allocation2 + $0xb0] ss:$8 sps:$4 sm:$0xff]  }
  0x69   :  { %2148 = vmatprep.subr.bf16.mxu0 %v2779_v8  ;;  %v2839_v43 = vld [vmem:[#allocation7 + $0x40] ss:$8 sps:$4 sm:$0xff]   ;;  %v3203_v45 = vld [vmem:[#allocation2 + $0xc4] ss:$8 sps:$4 sm:$0xff]   ;;  %v2840_v46 = vld [vmem:[#allocation7 + $0x50] ss:$8 sps:$4 sm:$0xff]  }
  0x6a   :  { %v2841_v47 = vld [vmem:[#allocation7 + $0x60] ss:$8 sps:$4 sm:$0xff]   ;;  %v3209_v49 = vld [vmem:[#allocation2 + $0xd4] ss:$8 sps:$4 sm:$0xff]   ;;  %v2842_v50 = vld [vmem:[#allocation7 + $0x70] ss:$8 sps:$4 sm:$0xff]  }
  0x6b   :  { %2505 = vmatpush3.bf16.msra.mxu1 %v2837_v23  ;;  %v3207_v48 = vld [vmem:[#allocation2 + $0xc0] ss:$8 sps:$4 sm:$0xff]   ;;  %v3213_v51 = vld [vmem:[#allocation2 + $0xd0] ss:$8 sps:$4 sm:$0xff]   ;;  %v3215_v52 = vld [vmem:[#allocation2 + $0xe4] ss:$8 sps:$4 sm:$0xff]  }
  0x6c   :  { %2149 = vmatpush3.bf16.msra.mxu0 %v2780_v9  ;;  %2506 = vmatprep.subr.bf16.mxu1 %v2838_v25  ;;  %v3219_v53 = vld [vmem:[#allocation2 + $0xe0] ss:$8 sps:$4 sm:$0xff]   ;;  %v3221_v54 = vld [vmem:[#allocation2 + $0xf4] ss:$8 sps:$4 sm:$0xff]   ;;  %v3225_v55 = vld [vmem:[#allocation2 + $0xf0] ss:$8 sps:$4 sm:$0xff]  }
  0x6d   :  { %2150 = vmatprep.subr.bf16.mxu0 %v2781_v10  ;;  %v2843_v57 = vld [vmem:[#allocation7 + $0x4] ss:$8 sps:$4 sm:$0xff]   ;;  %v2844_v7 = vld [vmem:[#allocation7 + $0x14] ss:$8 sps:$4 sm:$0xff]  }
  0x6e   :  { %v2847_v21 = vld [vmem:[#allocation7 + $0x44] ss:$8 sps:$4 sm:$0xff]  }
  0x6f   :  { %2507 = vmatpush3.bf16.msra.mxu1 %v2838_v25  ;;  %v2848_v25 = vld [vmem:[#allocation7 + $0x54] ss:$8 sps:$4 sm:$0xff]  }
  0x70   :  { %2151 = vmatpush3.bf16.msra.mxu0 %v2782_v12  ;;  %2508 = vmatprep.subr.bf16.mxu1 %v2839_v43  ;;  %v2845_v12 = vld [vmem:[#allocation7 + $0x24] ss:$8 sps:$4 sm:$0xff]  }
  0x71   :  { %2152 = vmatprep.subr.bf16.mxu0 %v2783_v13 }
  0x73   :  { %2509 = vmatpush3.bf16.msra.mxu1 %v2839_v43 }
  0x74   :  { %2153 = vmatpush3.bf16.msra.mxu0 %v2784_v14  ;;  %2510 = vmatprep.subr.bf16.mxu1 %v2840_v46 }
  0x75   :  { %2154 = vmatprep.subr.bf16.mxu0 %v2785_v15 }
  0x77   :  { %2511 = vmatpush3.bf16.msra.mxu1 %v2840_v46 }
  0x78   :  { %2155 = vmatpush3.bf16.msra.mxu0 %v2786_v16  ;;  %2512 = vmatprep.subr.bf16.mxu1 %v2841_v47  ;;  %v2846_v16 = vld [vmem:[#allocation7 + $0x34] ss:$8 sps:$4 sm:$0xff]  }
  0x7b   :  { %458 = vmatmul.mubr.bf16.vlgmr.msra.gmra.mrb[0].mxu0 %v2787_v17  ;;  %2513 = vmatpush3.bf16.msra.mxu1 %v2841_v47 }
  0x7c   :  { %465 = vmatprep.mubr.bf16.mxu0 %v2790_v18  ;;  %2514 = vmatprep.subr.bf16.mxu1 %v2842_v50 }
  0x7f   :  { %2515 = vmatpush3.bf16.msra.mxu1 %v2842_v50 }
  0x80   :  { %2548 = vmatprep.subr.bf16.mxu1 %v2843_v57 }
  0x83   :  { %466 = vmatmul.mubr.bf16.gmra.mrb[4].mxu0 %v2792_v19 }
  0x84   :  { %473 = vmatprep.mubr.bf16.mxu0 %v2793_v20 }
  0x8b   :  { %474 = vmatmul.mubr.bf16.gmra.mrb[8].mxu0 %v2795_v24 }
  0x8c   :  { %481 = vmatprep.mubr.bf16.mxu0 %v2796_v26 }
  0x93   :  { %482 = vmatmul.mubr.bf16.gmra.mrb[12].mxu0 %v2798_v27 }
  0x94   :  { %489 = vmatprep.mubr.bf16.mxu0 %v2799_v28 }
  0x9b   :  { %490 = vmatmul.mubr.bf16.gmra.mrb[16].mxu0 %v3159_v29 }
  0x9c   :  { %497 = vmatprep.mubr.bf16.mxu0 %v3161_v30 }
  0xa3   :  { %498 = vmatmul.mubr.bf16.gmra.mrb[20].mxu0 %v3165_v31 }
  0xa4   :  { %505 = vmatprep.mubr.bf16.mxu0 %v3167_v32 }
  0xab   :  { %506 = vmatmul.mubr.bf16.gmra.mrb[24].mxu0 %v3171_v33 }
  0xac   :  { %513 = vmatprep.mubr.bf16.mxu0 %v3173_v34 }
  0xb3   :  { %514 = vmatmul.mubr.bf16.gmra.mrb[28].mxu0 %v3177_v35 }
  0xb4   :  { %521 = vmatprep.mubr.bf16.mxu0 %v3179_v36 }
  0xbb   :  { %522 = vmatmul.mubr.bf16.gmra.mrb[32].mxu0 %v3183_v37 }
  0xbc   :  { %529 = vmatprep.mubr.bf16.mxu0 %v3185_v38 }
  0xc3   :  { %530 = vmatmul.mubr.bf16.gmra.mrb[36].mxu0 %v3189_v39 }
  0xc4   :  { %537 = vmatprep.mubr.bf16.mxu0 %v3191_v40 }
  0xcb   :  { %538 = vmatmul.mubr.bf16.gmra.mrb[40].mxu0 %v3195_v41 }
  0xcc   :  { %545 = vmatprep.mubr.bf16.mxu0 %v3197_v42 }
  0xd3   :  { %546 = vmatmul.mubr.bf16.gmra.mrb[44].mxu0 %v3201_v44 }
  0xd4   :  { %553 = vmatprep.mubr.bf16.mxu0 %v3203_v45 }
  0xdb   :  { %554 = vmatmul.mubr.bf16.gmra.mrb[48].mxu0 %v3207_v48 }
  0xdc   :  { %561 = vmatprep.mubr.bf16.mxu0 %v3209_v49 }
  0xe3   :  { %562 = vmatmul.mubr.bf16.gmra.mrb[52].mxu0 %v3213_v51 }
  0xe4   :  { %569 = vmatprep.mubr.bf16.mxu0 %v3215_v52 }
  0xeb   :  { %570 = vmatmul.mubr.bf16.gmra.mrb[56].mxu0 %v3219_v53 }
  0xec   :  { %577 = vmatprep.mubr.bf16.mxu0 %v3221_v54 }
  0xf3   :  { %578 = vmatmul.mubr.bf16.gmra.mrb[60].mxu0 %v3225_v55 }
  0xf4   :  { %1194 = vmatprep.mubr.bf16.mxu0 %v3156_v11 }
 0x14e   :  { %v2156_v56 = vpop.f32.mrb[0].mxu0 }
 0x14f   :  { %v2157_v58 = vpop.f32.mrb[1].mxu0 }
 0x150   :  { %v2158_v59 = vadd.f32 %v2157_v58, %v2156_v56  ;;  %v2159_v60 = vpop.f32.mrb[2].mxu0 }
 0x151   :  { %v2160_v61 = vpop.f32.mrb[3].mxu0 }
 0x152   :  { %v2161_v62 = vadd.f32 %v2160_v61, %v2159_v60 }
 0x154   :  { %v586_v63 = vpack.c.bf16 %v2161_v62, %v2158_v59 }
 0x156   :  { %v2162_v0 = vpop.f32.mrb[4].mxu0  ;;  %2516 = vmatprep.mubr.bf16.mxu1 %v586_v63 }
 0x157   :  { %v2163_v1 = vpop.f32.mrb[5].mxu0 }
 0x158   :  { %v2164_v2 = vadd.f32 %v2163_v1, %v2162_v0  ;;  %v2165_v3 = vpop.f32.mrb[6].mxu0 }
 0x159   :  { %v2166_v4 = vpop.f32.mrb[7].mxu0 }
 0x15a   :  { %v2167_v5 = vadd.f32 %v2166_v4, %v2165_v3 }
 0x15c   :  { %v587_v6 = vpack.c.bf16 %v2167_v5, %v2164_v2 }
 0x15e   :  { %v2168_v8 = vpop.f32.mrb[8].mxu0  ;;  %2517 = vmatmul.mubr.bf16.vlgmr.msra.gmra.mrb[0].mxu1 %v587_v6 }
 0x15f   :  { %v2169_v9 = vpop.f32.mrb[9].mxu0  ;;  %2549 = vmatpush3.bf16.msra.mxu1 %v2843_v57 }
 0x160   :  { %v2170_v10 = vadd.f32 %v2169_v9, %v2168_v8  ;;  %v2171_v11 = vpop.f32.mrb[10].mxu0  ;;  %2550 = vmatprep.subr.bf16.mxu1 %v2844_v7 }
 0x161   :  { %v2172_v13 = vpop.f32.mrb[11].mxu0 }
 0x162   :  { %v2173_v14 = vadd.f32 %v2172_v13, %v2171_v11 }
 0x163   :  { %2551 = vmatpush3.bf16.msra.mxu1 %v2844_v7 }
 0x164   :  { %v588_v15 = vpack.c.bf16 %v2173_v14, %v2170_v10  ;;  %2552 = vmatprep.subr.bf16.mxu1 %v2845_v12 }
 0x166   :  { %v2174_v17 = vpop.f32.mrb[12].mxu0  ;;  %2520 = vmatprep.mubr.bf16.mxu1 %v588_v15 }
 0x167   :  { %v2175_v18 = vpop.f32.mrb[13].mxu0  ;;  %2553 = vmatpush3.bf16.msra.mxu1 %v2845_v12 }
 0x168   :  { %v2176_v19 = vadd.f32 %v2175_v18, %v2174_v17  ;;  %v2177_v20 = vpop.f32.mrb[14].mxu0  ;;  %2554 = vmatprep.subr.bf16.mxu1 %v2846_v16 }
 0x169   :  { %v2178_v22 = vpop.f32.mrb[15].mxu0 }
 0x16a   :  { %v2179_v23 = vadd.f32 %v2178_v22, %v2177_v20 }
 0x16b   :  { %2555 = vmatpush3.bf16.msra.mxu1 %v2846_v16 }
 0x16c   :  { %v589_v24 = vpack.c.bf16 %v2179_v23, %v2176_v19  ;;  %2556 = vmatprep.subr.bf16.mxu1 %v2847_v21 }
 0x16e   :  { %v2180_v26 = vpop.f32.mrb[16].mxu0  ;;  %2521 = vmatmul.mubr.bf16.gmra.mrb[4].mxu1 %v589_v24 }
 0x16f   :  { %v2181_v27 = vpop.f32.mrb[17].mxu0  ;;  %2557 = vmatpush3.bf16.msra.mxu1 %v2847_v21 }
 0x170   :  { %v2182_v28 = vadd.f32 %v2181_v27, %v2180_v26  ;;  %v2183_v43 = vpop.f32.mrb[18].mxu0  ;;  %2558 = vmatprep.subr.bf16.mxu1 %v2848_v25 }
 0x171   :  { %v2184_v46 = vpop.f32.mrb[19].mxu0 }
 0x172   :  { %v2185_v47 = vadd.f32 %v2184_v46, %v2183_v43 }
 0x173   :  { %2559 = vmatpush3.bf16.msra.mxu1 %v2848_v25 }
 0x174   :  { %v590_v50 = vpack.c.bf16 %v2185_v47, %v2182_v28 }
 0x176   :  { %v2186_v56 = vpop.f32.mrb[20].mxu0  ;;  %2524 = vmatprep.mubr.bf16.mxu1 %v590_v50 }
 0x177   :  { %v2187_v57 = vpop.f32.mrb[21].mxu0 }
 0x178   :  { %v2188_v58 = vadd.f32 %v2187_v57, %v2186_v56  ;;  %v2189_v59 = vpop.f32.mrb[22].mxu0 }
 0x179   :  { %v2190_v60 = vpop.f32.mrb[23].mxu0 }
 0x17a   :  { %v2191_v61 = vadd.f32 %v2190_v60, %v2189_v59 }
 0x17c   :  { %v591_v62 = vpack.c.bf16 %v2191_v61, %v2188_v58 }
 0x17e   :  { %v2192_v63 = vpop.f32.mrb[24].mxu0  ;;  %2525 = vmatmul.mubr.bf16.gmra.mrb[8].mxu1 %v591_v62 }
 0x17f   :  { %v2193_v0 = vpop.f32.mrb[25].mxu0 }
 0x180   :  { %v2194_v1 = vadd.f32 %v2193_v0, %v2192_v63  ;;  %v2195_v2 = vpop.f32.mrb[26].mxu0 }
 0x181   :  { %v2196_v3 = vpop.f32.mrb[27].mxu0 }
 0x182   :  { %v2197_v4 = vadd.f32 %v2196_v3, %v2195_v2 }
 0x184   :  { %v592_v5 = vpack.c.bf16 %v2197_v4, %v2194_v1 }
 0x186   :  { %v2198_v6 = vpop.f32.mrb[28].mxu0  ;;  %2528 = vmatprep.mubr.bf16.mxu1 %v592_v5 }
 0x187   :  { %v2199_v7 = vpop.f32.mrb[29].mxu0 }
 0x188   :  { %v2200_v8 = vadd.f32 %v2199_v7, %v2198_v6  ;;  %v2201_v9 = vpop.f32.mrb[30].mxu0  ;;  %v2849_v6 = vld [vmem:[#allocation7 + $0x64] ss:$8 sps:$4 sm:$0xff]  }
 0x189   :  { %v2202_v10 = vpop.f32.mrb[31].mxu0  ;;  %2560 = vmatprep.subr.bf16.mxu1 %v2849_v6 }
 0x18a   :  { %v2203_v11 = vadd.f32 %v2202_v10, %v2201_v9  ;;  %2561 = vmatpush3.bf16.msra.mxu1 %v2849_v6  ;;  %v2850_v9 = vld [vmem:[#allocation7 + $0x74] ss:$8 sps:$4 sm:$0xff]  }
 0x18b   :  { %2562 = vmatprep.subr.bf16.mxu1 %v2850_v9 }
 0x18c   :  { %v593_v12 = vpack.c.bf16 %v2203_v11, %v2200_v8 }
 0x18e   :  { %v2204_v13 = vpop.f32.mrb[32].mxu0  ;;  %2529 = vmatmul.mubr.bf16.gmra.mrb[12].mxu1 %v593_v12 }
 0x18f   :  { %v2205_v14 = vpop.f32.mrb[33].mxu0  ;;  %2563 = vmatpush3.bf16.msra.mxu1 %v2850_v9 }
 0x190   :  { %v2206_v15 = vadd.f32 %v2205_v14, %v2204_v13  ;;  %v2207_v16 = vpop.f32.mrb[34].mxu0 }
 0x191   :  { %v2208_v17 = vpop.f32.mrb[35].mxu0 }
 0x192   :  { %v2209_v18 = vadd.f32 %v2208_v17, %v2207_v16 }
 0x194   :  { %v594_v19 = vpack.c.bf16 %v2209_v18, %v2206_v15 }
 0x196   :  { %v2210_v20 = vpop.f32.mrb[36].mxu0  ;;  %2532 = vmatprep.mubr.bf16.mxu1 %v594_v19 }
 0x197   :  { %v2211_v21 = vpop.f32.mrb[37].mxu0 }
 0x198   :  { %v2212_v22 = vadd.f32 %v2211_v21, %v2210_v20  ;;  %v2213_v23 = vpop.f32.mrb[38].mxu0 }
 0x199   :  { %v2214_v24 = vpop.f32.mrb[39].mxu0 }
 0x19a   :  { %v2215_v25 = vadd.f32 %v2214_v24, %v2213_v23 }
 0x19c   :  { %v595_v26 = vpack.c.bf16 %v2215_v25, %v2212_v22 }
 0x19e   :  { %v2216_v27 = vpop.f32.mrb[40].mxu0  ;;  %2533 = vmatmul.mubr.bf16.gmra.mrb[16].mxu1 %v595_v26 }
 0x19f   :  { %v2217_v28 = vpop.f32.mrb[41].mxu0 }
 0x1a0   :  { %v2218_v43 = vadd.f32 %v2217_v28, %v2216_v27  ;;  %v2219_v46 = vpop.f32.mrb[42].mxu0 }
 0x1a1   :  { %v2220_v47 = vpop.f32.mrb[43].mxu0 }
 0x1a2   :  { %v2221_v50 = vadd.f32 %v2220_v47, %v2219_v46  ;;  %v3232_v46 = vld [vmem:[%s3469_s3] ss:$0 sm:$0xff] }
 0x1a4   :  { %v596_v56 = vpack.c.bf16 %v2221_v50, %v2218_v43 }
 0x1a6   :  { %v2222_v57 = vpop.f32.mrb[44].mxu0  ;;  %2536 = vmatprep.mubr.bf16.mxu1 %v596_v56 }
 0x1a7   :  { %v2223_v58 = vpop.f32.mrb[45].mxu0 }
 0x1a8   :  { %v2224_v59 = vadd.f32 %v2223_v58, %v2222_v57  ;;  %v2225_v60 = vpop.f32.mrb[46].mxu0 }
 0x1a9   :  { %v2226_v61 = vpop.f32.mrb[47].mxu0 }
 0x1aa   :  { %v2227_v62 = vadd.f32 %v2226_v61, %v2225_v60 }
 0x1ac   :  { %v597_v63 = vpack.c.bf16 %v2227_v62, %v2224_v59 }
 0x1ae   :  { %v2228_v0 = vpop.f32.mrb[48].mxu0  ;;  %2537 = vmatmul.mubr.bf16.gmra.mrb[20].mxu1 %v597_v63 }
 0x1af   :  { %v2229_v1 = vpop.f32.mrb[49].mxu0 }
 0x1b0   :  { %v2230_v2 = vadd.f32 %v2229_v1, %v2228_v0  ;;  %v2231_v3 = vpop.f32.mrb[50].mxu0 }
 0x1b1   :  { %v2232_v4 = vpop.f32.mrb[51].mxu0 }
 0x1b2   :  { %v2233_v5 = vadd.f32 %v2232_v4, %v2231_v3 }
 0x1b4   :  { %v598_v7 = vpack.c.bf16 %v2233_v5, %v2230_v2 }
 0x1b6   :  { %v2234_v8 = vpop.f32.mrb[52].mxu0  ;;  %2540 = vmatprep.mubr.bf16.mxu1 %v598_v7 }
 0x1b7   :  { %v2235_v10 = vpop.f32.mrb[53].mxu0 }
 0x1b8   :  { %v2236_v11 = vadd.f32 %v2235_v10, %v2234_v8  ;;  %v2237_v12 = vpop.f32.mrb[54].mxu0 }
 0x1b9   :  { %v2238_v13 = vpop.f32.mrb[55].mxu0 }
 0x1ba   :  { %v2239_v14 = vadd.f32 %v2238_v13, %v2237_v12 }
 0x1bc   :  { %v599_v15 = vpack.c.bf16 %v2239_v14, %v2236_v11 }
 0x1be   :  { %v2240_v16 = vpop.f32.mrb[56].mxu0  ;;  %2541 = vmatmul.mubr.bf16.gmra.mrb[24].mxu1 %v599_v15 }
 0x1bf   :  { %v2241_v17 = vpop.f32.mrb[57].mxu0 }
 0x1c0   :  { %v2242_v18 = vadd.f32 %v2241_v17, %v2240_v16  ;;  %v2243_v19 = vpop.f32.mrb[58].mxu0 }
 0x1c1   :  { %v2244_v20 = vpop.f32.mrb[59].mxu0 }
 0x1c2   :  { %v2245_v21 = vadd.f32 %v2244_v20, %v2243_v19 }
 0x1c4   :  { %v600_v22 = vpack.c.bf16 %v2245_v21, %v2242_v18 }
 0x1c6   :  { %v2246_v23 = vpop.f32.mrb[60].mxu0  ;;  %2544 = vmatprep.mubr.bf16.mxu1 %v600_v22 }
 0x1c7   :  { %v2247_v24 = vpop.f32.mrb[61].mxu0 }
 0x1c8   :  { %v2248_v25 = vadd.f32 %v2247_v24, %v2246_v23  ;;  %v2249_v26 = vpop.f32.mrb[62].mxu0 }
 0x1c9   :  { %v2250_v27 = vpop.f32.mrb[63].mxu0 }
 0x1ca   :  { %v2251_v28 = vadd.f32 %v2250_v27, %v2249_v26 }
 0x1cc   :  { %v601_v43 = vpack.c.bf16 %v2251_v28, %v2248_v25 }
 0x1ce   :  { %2545 = vmatmul.mubr.bf16.gmra.mrb[28].mxu1 %v601_v43 }
 0x231   :  { %v2518_v47 = vpop.f32.mrb[0].mxu1 }
 0x232   :  { %v716_v50 = vadd.f32 %v2518_v47, %v3232_v46  ;;  %v707_v56 = vpop.f32.mrb[1].mxu1 }
 0x233   :  { %v708_v57 = vadd.f32 %v3232_v46, %v707_v56  ;;  %v2519_v58 = vpop.f32.mrb[2].mxu1 }
 0x234   :  { %v719_v59 = vadd.f32 %v2519_v58, %v3232_v46  ;;  %v710_v60 = vpop.f32.mrb[3].mxu1  ;;  %v836_v62 = vmax.f32 %v716_v50, 0.0 }
 0x235   :  { %v711_v61 = vadd.f32 %v3232_v46, %v710_v60  ;;  %v834_v0 = vmax.f32 %v708_v57, 0.0 }
 0x236   :  { %v837_v63 = vmax.f32 %v719_v59, 0.0 }
 0x237   :  { %v835_v1 = vmax.f32 %v711_v61, 0.0 }
 0x238   :  { %v867_v2 = vpack.c.bf16 %v837_v63, %v836_v62 }
 0x239   :  { %v866_v3 = vpack.c.bf16 %v835_v1, %v834_v0 }
 0x23b   :  { %2564 = vmatprep.mubr.bf16.mxu1 %v866_v3 }
 0x23c   :  { %2565 = vmatmul.mubr.bf16.vlgmr.msra.gmra.mrb[32].mxu1 %v867_v2 }
 0x241   :  { %v2522_v4 = vpop.f32.mrb[4].mxu1 }
 0x242   :  { %v732_v5 = vadd.f32 %v2522_v4, %v3232_v46  ;;  %v723_v6 = vpop.f32.mrb[5].mxu1 }
 0x243   :  { %v724_v7 = vadd.f32 %v3232_v46, %v723_v6  ;;  %v2523_v8 = vpop.f32.mrb[6].mxu1 }
 0x244   :  { %v735_v9 = vadd.f32 %v2523_v8, %v3232_v46  ;;  %v726_v10 = vpop.f32.mrb[7].mxu1  ;;  %v840_v12 = vmax.f32 %v732_v5, 0.0 }
 0x245   :  { %v727_v11 = vadd.f32 %v3232_v46, %v726_v10  ;;  %v838_v14 = vmax.f32 %v724_v7, 0.0 }
 0x246   :  { %v841_v13 = vmax.f32 %v735_v9, 0.0 }
 0x247   :  { %v839_v15 = vmax.f32 %v727_v11, 0.0 }
 0x248   :  { %v869_v16 = vpack.c.bf16 %v841_v13, %v840_v12 }
 0x249   :  { %v868_v17 = vpack.c.bf16 %v839_v15, %v838_v14 }
 0x24b   :  { %2568 = vmatprep.mubr.bf16.mxu1 %v868_v17 }
 0x24c   :  { %2569 = vmatmul.mubr.bf16.gmra.mrb[36].mxu1 %v869_v16 }
 0x251   :  { %v2526_v18 = vpop.f32.mrb[8].mxu1 }
 0x252   :  { %v748_v19 = vadd.f32 %v2526_v18, %v3232_v46  ;;  %v739_v20 = vpop.f32.mrb[9].mxu1 }
 0x253   :  { %v740_v21 = vadd.f32 %v3232_v46, %v739_v20  ;;  %v2527_v22 = vpop.f32.mrb[10].mxu1 }
 0x254   :  { %v751_v23 = vadd.f32 %v2527_v22, %v3232_v46  ;;  %v742_v24 = vpop.f32.mrb[11].mxu1  ;;  %v844_v26 = vmax.f32 %v748_v19, 0.0 }
 0x255   :  { %v743_v25 = vadd.f32 %v3232_v46, %v742_v24  ;;  %v842_v28 = vmax.f32 %v740_v21, 0.0 }
 0x256   :  { %v845_v27 = vmax.f32 %v751_v23, 0.0 }
 0x257   :  { %v843_v43 = vmax.f32 %v743_v25, 0.0 }
 0x258   :  { %v871_v47 = vpack.c.bf16 %v845_v27, %v844_v26 }
 0x259   :  { %v870_v50 = vpack.c.bf16 %v843_v43, %v842_v28 }
 0x25b   :  { %2572 = vmatprep.mubr.bf16.mxu1 %v870_v50 }
 0x25c   :  { %2573 = vmatmul.mubr.bf16.gmra.mrb[40].mxu1 %v871_v47 }
 0x261   :  { %v2530_v56 = vpop.f32.mrb[12].mxu1 }
 0x262   :  { %v764_v57 = vadd.f32 %v2530_v56, %v3232_v46  ;;  %v755_v58 = vpop.f32.mrb[13].mxu1 }
 0x263   :  { %v756_v59 = vadd.f32 %v3232_v46, %v755_v58  ;;  %v2531_v60 = vpop.f32.mrb[14].mxu1 }
 0x264   :  { %v767_v61 = vadd.f32 %v2531_v60, %v3232_v46  ;;  %v758_v62 = vpop.f32.mrb[15].mxu1  ;;  %v848_v0 = vmax.f32 %v764_v57, 0.0 }
 0x265   :  { %v759_v63 = vadd.f32 %v3232_v46, %v758_v62  ;;  %v846_v2 = vmax.f32 %v756_v59, 0.0 }
 0x266   :  { %v849_v1 = vmax.f32 %v767_v61, 0.0 }
 0x267   :  { %v847_v3 = vmax.f32 %v759_v63, 0.0 }
 0x268   :  { %v873_v4 = vpack.c.bf16 %v849_v1, %v848_v0 }
 0x269   :  { %v872_v5 = vpack.c.bf16 %v847_v3, %v846_v2 }
 0x26b   :  { %2576 = vmatprep.mubr.bf16.mxu1 %v872_v5 }
 0x26c   :  { %2577 = vmatmul.mubr.bf16.gmra.mrb[44].mxu1 %v873_v4 }
 0x271   :  { %v2534_v6 = vpop.f32.mrb[16].mxu1 }
 0x272   :  { %v780_v7 = vadd.f32 %v2534_v6, %v3232_v46  ;;  %v771_v8 = vpop.f32.mrb[17].mxu1 }
 0x273   :  { %v772_v9 = vadd.f32 %v3232_v46, %v771_v8  ;;  %v2535_v10 = vpop.f32.mrb[18].mxu1 }
 0x274   :  { %v783_v11 = vadd.f32 %v2535_v10, %v3232_v46  ;;  %v774_v12 = vpop.f32.mrb[19].mxu1  ;;  %v852_v14 = vmax.f32 %v780_v7, 0.0 }
 0x275   :  { %v775_v13 = vadd.f32 %v3232_v46, %v774_v12  ;;  %v850_v16 = vmax.f32 %v772_v9, 0.0 }
 0x276   :  { %v853_v15 = vmax.f32 %v783_v11, 0.0 }
 0x277   :  { %v851_v17 = vmax.f32 %v775_v13, 0.0 }
 0x278   :  { %v875_v18 = vpack.c.bf16 %v853_v15, %v852_v14 }
 0x279   :  { %v874_v19 = vpack.c.bf16 %v851_v17, %v850_v16 }
 0x27b   :  { %2580 = vmatprep.mubr.bf16.mxu1 %v874_v19 }
 0x27c   :  { %2581 = vmatmul.mubr.bf16.gmra.mrb[48].mxu1 %v875_v18 }
 0x281   :  { %v2538_v20 = vpop.f32.mrb[20].mxu1 }
 0x282   :  { %v796_v21 = vadd.f32 %v2538_v20, %v3232_v46  ;;  %v787_v22 = vpop.f32.mrb[21].mxu1 }
 0x283   :  { %v788_v23 = vadd.f32 %v3232_v46, %v787_v22  ;;  %v2539_v24 = vpop.f32.mrb[22].mxu1  ;;  %v3269_v22 = vld [vmem:[%s3469_s3 + $0x1] ss:$0 sm:$0xff] }
 0x284   :  { %v799_v25 = vadd.f32 %v2539_v24, %v3232_v46  ;;  %v790_v26 = vpop.f32.mrb[23].mxu1  ;;  %v856_v28 = vmax.f32 %v796_v21, 0.0 }
 0x285   :  { %v791_v27 = vadd.f32 %v3232_v46, %v790_v26  ;;  %v854_v47 = vmax.f32 %v788_v23, 0.0 }
 0x286   :  { %v857_v43 = vmax.f32 %v799_v25, 0.0 }
 0x287   :  { %v855_v50 = vmax.f32 %v791_v27, 0.0 }
 0x288   :  { %v877_v56 = vpack.c.bf16 %v857_v43, %v856_v28 }
 0x289   :  { %v876_v57 = vpack.c.bf16 %v855_v50, %v854_v47 }
 0x28b   :  { %2584 = vmatprep.mubr.bf16.mxu1 %v876_v57 }
 0x28c   :  { %2585 = vmatmul.mubr.bf16.gmra.mrb[52].mxu1 %v877_v56 }
 0x291   :  { %v2542_v58 = vpop.f32.mrb[24].mxu1 }
 0x292   :  { %v812_v59 = vadd.f32 %v2542_v58, %v3232_v46  ;;  %v803_v60 = vpop.f32.mrb[25].mxu1 }
 0x293   :  { %v804_v61 = vadd.f32 %v3232_v46, %v803_v60  ;;  %v2543_v62 = vpop.f32.mrb[26].mxu1 }
 0x294   :  { %v815_v63 = vadd.f32 %v2543_v62, %v3232_v46  ;;  %v806_v0 = vpop.f32.mrb[27].mxu1  ;;  %v860_v2 = vmax.f32 %v812_v59, 0.0 }
 0x295   :  { %v807_v1 = vadd.f32 %v3232_v46, %v806_v0  ;;  %v858_v4 = vmax.f32 %v804_v61, 0.0 }
 0x296   :  { %v861_v3 = vmax.f32 %v815_v63, 0.0 }
 0x297   :  { %v859_v5 = vmax.f32 %v807_v1, 0.0 }
 0x298   :  { %v879_v6 = vpack.c.bf16 %v861_v3, %v860_v2 }
 0x299   :  { %v878_v7 = vpack.c.bf16 %v859_v5, %v858_v4 }
 0x29b   :  { %2588 = vmatprep.mubr.bf16.mxu1 %v878_v7 }
 0x29c   :  { %2589 = vmatmul.mubr.bf16.gmra.mrb[56].mxu1 %v879_v6 }
 0x2a1   :  { %v2546_v8 = vpop.f32.mrb[28].mxu1 }
 0x2a2   :  { %v828_v9 = vadd.f32 %v2546_v8, %v3232_v46  ;;  %v819_v10 = vpop.f32.mrb[29].mxu1 }
 0x2a3   :  { %v820_v11 = vadd.f32 %v3232_v46, %v819_v10  ;;  %v2547_v12 = vpop.f32.mrb[30].mxu1 }
 0x2a4   :  { %v831_v13 = vadd.f32 %v2547_v12, %v3232_v46  ;;  %v822_v14 = vpop.f32.mrb[31].mxu1  ;;  %v864_v16 = vmax.f32 %v828_v9, 0.0 }
 0x2a5   :  { %v823_v15 = vadd.f32 %v3232_v46, %v822_v14  ;;  %v862_v18 = vmax.f32 %v820_v11, 0.0 }
 0x2a6   :  { %v865_v17 = vmax.f32 %v831_v13, 0.0 }
 0x2a7   :  { %v863_v19 = vmax.f32 %v823_v15, 0.0 }
 0x2a8   :  { %v881_v20 = vpack.c.bf16 %v865_v17, %v864_v16 }
 0x2a9   :  { %v880_v21 = vpack.c.bf16 %v863_v19, %v862_v18 }
 0x2ab   :  { %2592 = vmatprep.mubr.bf16.mxu1 %v880_v21 }
 0x2ac   :  { %2593 = vmatmul.mubr.bf16.gmra.mrb[60].mxu1 %v881_v20 }
 0x30f   :  { %v2566_v23 = vpop.f32.mrb[32].mxu1 }
 0x310   :  { %v996_v24 = vadd.f32 %v2566_v23, %v3269_v22  ;;  %v987_v25 = vpop.f32.mrb[33].mxu1 }
 0x311   :  { %v988_v26 = vadd.f32 %v3269_v22, %v987_v25  ;;  %v2567_v46 = vpop.f32.mrb[34].mxu1 }
 0x312   :  { %v999_v27 = vadd.f32 %v2567_v46, %v3269_v22  ;;  %v990_v28 = vpop.f32.mrb[35].mxu1  ;;  %v1116_v47 = vmax.f32 %v996_v24, 0.0 }
 0x313   :  { %v991_v43 = vadd.f32 %v3269_v22, %v990_v28  ;;  %v1114_v56 = vmax.f32 %v988_v26, 0.0 }
 0x314   :  { %v1117_v50 = vmax.f32 %v999_v27, 0.0 }
 0x315   :  { %v1115_v57 = vmax.f32 %v991_v43, 0.0 }
 0x316   :  { %v1147_v58 = vpack.c.bf16 %v1117_v50, %v1116_v47 }
 0x317   :  { %v1146_v59 = vpack.c.bf16 %v1115_v57, %v1114_v56 }
 0x31f   :  { %v2570_v60 = vpop.f32.mrb[36].mxu1 }
 0x320   :  { %v1012_v61 = vadd.f32 %v2570_v60, %v3269_v22  ;;  %v1003_v62 = vpop.f32.mrb[37].mxu1 }
 0x321   :  { %v1004_v63 = vadd.f32 %v3269_v22, %v1003_v62  ;;  %v2571_v0 = vpop.f32.mrb[38].mxu1 }
 0x322   :  { %v1015_v1 = vadd.f32 %v2571_v0, %v3269_v22  ;;  %v1006_v2 = vpop.f32.mrb[39].mxu1  ;;  %v1120_v4 = vmax.f32 %v1012_v61, 0.0 }
 0x323   :  { %v1007_v3 = vadd.f32 %v3269_v22, %v1006_v2  ;;  %v1118_v6 = vmax.f32 %v1004_v63, 0.0 }
 0x324   :  { %v1121_v5 = vmax.f32 %v1015_v1, 0.0 }
 0x325   :  { %v1119_v7 = vmax.f32 %v1007_v3, 0.0 }
 0x326   :  { %v3279_v8 = vpack.c.bf16 %v1121_v5, %v1120_v4 }
 0x327   :  { %v1148_v9 = vpack.c.bf16 %v1119_v7, %v1118_v6 }
 0x32f   :  { %v2574_v10 = vpop.f32.mrb[40].mxu1 }
 0x330   :  { %v1028_v11 = vadd.f32 %v2574_v10, %v3269_v22  ;;  %v1019_v12 = vpop.f32.mrb[41].mxu1 }
 0x331   :  { %v1020_v13 = vadd.f32 %v3269_v22, %v1019_v12  ;;  %v2575_v14 = vpop.f32.mrb[42].mxu1 }
 0x332   :  { %v1031_v15 = vadd.f32 %v2575_v14, %v3269_v22  ;;  %v1022_v16 = vpop.f32.mrb[43].mxu1  ;;  %v1124_v18 = vmax.f32 %v1028_v11, 0.0 }
 0x333   :  { %v1023_v17 = vadd.f32 %v3269_v22, %v1022_v16  ;;  %v1122_v20 = vmax.f32 %v1020_v13, 0.0 }
 0x334   :  { %v1125_v19 = vmax.f32 %v1031_v15, 0.0 }
 0x335   :  { %v1123_v21 = vmax.f32 %v1023_v17, 0.0 }
 0x336   :  { %v3285_v23 = vpack.c.bf16 %v1125_v19, %v1124_v18 }
 0x337   :  { %v3287_v24 = vpack.c.bf16 %v1123_v21, %v1122_v20 }
 0x33f   :  { %v2578_v25 = vpop.f32.mrb[44].mxu1 }
 0x340   :  { %v1044_v26 = vadd.f32 %v2578_v25, %v3269_v22  ;;  %v1035_v46 = vpop.f32.mrb[45].mxu1 }
 0x341   :  { %v1036_v27 = vadd.f32 %v3269_v22, %v1035_v46  ;;  %v2579_v28 = vpop.f32.mrb[46].mxu1 }
 0x342   :  { %v1047_v43 = vadd.f32 %v2579_v28, %v3269_v22  ;;  %v1038_v47 = vpop.f32.mrb[47].mxu1  ;;  %v1128_v56 = vmax.f32 %v1044_v26, 0.0 }
 0x343   :  { %v1039_v50 = vadd.f32 %v3269_v22, %v1038_v47  ;;  %v1126_v60 = vmax.f32 %v1036_v27, 0.0 }
 0x344   :  { %v1129_v57 = vmax.f32 %v1047_v43, 0.0 }
 0x345   :  { %v1127_v61 = vmax.f32 %v1039_v50, 0.0 }
 0x346   :  { %v3293_v62 = vpack.c.bf16 %v1129_v57, %v1128_v56 }
 0x347   :  { %v3295_v63 = vpack.c.bf16 %v1127_v61, %v1126_v60 }
 0x34f   :  { %v2582_v0 = vpop.f32.mrb[48].mxu1 }
 0x350   :  { %v1060_v1 = vadd.f32 %v2582_v0, %v3269_v22  ;;  %v1051_v2 = vpop.f32.mrb[49].mxu1 }
 0x351   :  { %v1052_v3 = vadd.f32 %v3269_v22, %v1051_v2  ;;  %v2583_v4 = vpop.f32.mrb[50].mxu1 }
 0x352   :  { %v1063_v5 = vadd.f32 %v2583_v4, %v3269_v22  ;;  %v1054_v6 = vpop.f32.mrb[51].mxu1  ;;  %v1132_v10 = vmax.f32 %v1060_v1, 0.0 }
 0x353   :  { %v1055_v7 = vadd.f32 %v3269_v22, %v1054_v6  ;;  %v1130_v12 = vmax.f32 %v1052_v3, 0.0 }
 0x354   :  { %v1133_v11 = vmax.f32 %v1063_v5, 0.0 }
 0x355   :  { %v1131_v13 = vmax.f32 %v1055_v7, 0.0 }
 0x356   :  { %v1155_v14 = vpack.c.bf16 %v1133_v11, %v1132_v10 }
 0x357   :  { %v1154_v15 = vpack.c.bf16 %v1131_v13, %v1130_v12 }
 0x359   :  { %2300 = vmatprep.subr.bf16.mxu0 %v1154_v15 }
 0x35a   :  { %2301 = vmatpush3.bf16.msra.mxu0 %v1146_v59 }
 0x35b   :  { %2302 = vmatprep.subr.bf16.mxu0 %v1155_v14 }
 0x35e   :  { %2303 = vmatpush3.bf16.msra.mxu0 %v1147_v58 }
 0x35f   :  { %v2586_v16 = vpop.f32.mrb[52].mxu1 }
 0x360   :  { %v1076_v17 = vadd.f32 %v2586_v16, %v3269_v22  ;;  %v1067_v18 = vpop.f32.mrb[53].mxu1 }
 0x361   :  { %v1068_v19 = vadd.f32 %v3269_v22, %v1067_v18  ;;  %v2587_v20 = vpop.f32.mrb[54].mxu1 }
 0x362   :  { %v1079_v21 = vadd.f32 %v2587_v20, %v3269_v22  ;;  %v1070_v25 = vpop.f32.mrb[55].mxu1  ;;  %v1136_v46 = vmax.f32 %v1076_v17, 0.0 }
 0x363   :  { %v1071_v26 = vadd.f32 %v3269_v22, %v1070_v25  ;;  %v1134_v28 = vmax.f32 %v1068_v19, 0.0  ;;  %v2853_v25 = vld [vmem:[#allocation8 + $0x20] ss:$8 sps:$4 sm:$0xff]  }
 0x364   :  { %v1137_v27 = vmax.f32 %v1079_v21, 0.0  ;;  %v2852_v21 = vld [vmem:[#allocation8 + $0x10] ss:$8 sps:$4 sm:$0xff]  }
 0x365   :  { %v1135_v43 = vmax.f32 %v1071_v26, 0.0  ;;  %v2854_v26 = vld [vmem:[#allocation8 + $0x30] ss:$8 sps:$4 sm:$0xff]  }
 0x366   :  { %v1157_v47 = vpack.c.bf16 %v1137_v27, %v1136_v46  ;;  %v2871_v46 = vld [vmem:[#allocation2 + $0x14] ss:$8 sps:$4 sm:$0xff]   ;;  %v2872_v27 = vld [vmem:[#allocation2 + $0x10] ss:$8 sps:$4 sm:$0xff]  }
 0x367   :  { %v1156_v59 = vpack.c.bf16 %v1135_v43, %v1134_v28  ;;  %v2874_v28 = vld [vmem:[#allocation2 + $0x20] ss:$8 sps:$4 sm:$0xff]   ;;  %v2875_v43 = vld [vmem:[#allocation2 + $0x34] ss:$8 sps:$4 sm:$0xff]  }
 0x369   :  { %2304 = vmatprep.subr.bf16.mxu0 %v1156_v59 }
 0x36a   :  { %2305 = vmatpush3.bf16.msra.mxu0 %v1148_v9 }
 0x36b   :  { %2306 = vmatprep.subr.bf16.mxu0 %v1157_v47  ;;  %v2876_v47 = vld [vmem:[#allocation2 + $0x30] ss:$8 sps:$4 sm:$0xff]  }
 0x36e   :  { %2307 = vmatpush3.bf16.msra.mxu0 %v3279_v8 }
 0x36f   :  { %v2590_v58 = vpop.f32.mrb[56].mxu1 }
 0x370   :  { %v1092_v50 = vadd.f32 %v2590_v58, %v3269_v22  ;;  %v1083_v56 = vpop.f32.mrb[57].mxu1  ;;  %v2861_v58 = vld [vmem:[#allocation8 + $0x24] ss:$8 sps:$4 sm:$0xff]  }
 0x371   :  { %v1084_v57 = vadd.f32 %v3269_v22, %v1083_v56  ;;  %v2591_v60 = vpop.f32.mrb[58].mxu1 }
 0x372   :  { %v1095_v61 = vadd.f32 %v2591_v60, %v3269_v22  ;;  %v1086_v0 = vpop.f32.mrb[59].mxu1  ;;  %v1140_v2 = vmax.f32 %v1092_v50, 0.0  ;;  %v2862_v60 = vld [vmem:[#allocation8 + $0x34] ss:$8 sps:$4 sm:$0xff]  }
 0x373   :  { %v1087_v1 = vadd.f32 %v3269_v22, %v1086_v0  ;;  %v1138_v4 = vmax.f32 %v1084_v57, 0.0 }
 0x374   :  { %v1141_v3 = vmax.f32 %v1095_v61, 0.0 }
 0x375   :  { %v1139_v5 = vmax.f32 %v1087_v1, 0.0 }
 0x376   :  { %v1159_v9 = vpack.c.bf16 %v1141_v3, %v1140_v2  ;;  %v2863_v3 = vld [vmem:[#allocation8 + $0x44] ss:$8 sps:$4 sm:$0xff]  }
 0x377   :  { %v1158_v6 = vpack.c.bf16 %v1139_v5, %v1138_v4 }
 0x379   :  { %2308 = vmatprep.subr.bf16.mxu0 %v1158_v6  ;;  %v2864_v6 = vld [vmem:[#allocation8 + $0x54] ss:$8 sps:$4 sm:$0xff]  }
 0x37a   :  { %2309 = vmatpush3.bf16.msra.mxu0 %v3287_v24 }
 0x37b   :  { %2310 = vmatprep.subr.bf16.mxu0 %v1159_v9 }
 0x37e   :  { %2311 = vmatpush3.bf16.msra.mxu0 %v3285_v23  ;;  %v2851_v23 = vld [vmem:[#allocation8] ss:$8 sps:$4 sm:$0xff]  }
 0x37f   :  { %v2594_v8 = vpop.f32.mrb[60].mxu1  ;;  %2596 = vmatprep.subr.bf16.mxu1 %v2851_v23 }
 0x380   :  { %v1108_v7 = vadd.f32 %v2594_v8, %v3269_v22  ;;  %v1099_v10 = vpop.f32.mrb[61].mxu1  ;;  %2597 = vmatpush3.bf16.msra.mxu1 %v2851_v23 }
 0x381   :  { %v1100_v11 = vadd.f32 %v3269_v22, %v1099_v10  ;;  %v2595_v12 = vpop.f32.mrb[62].mxu1  ;;  %2598 = vmatprep.subr.bf16.mxu1 %v2852_v21 }
 0x382   :  { %v1111_v13 = vadd.f32 %v2595_v12, %v3269_v22  ;;  %v1102_v14 = vpop.f32.mrb[63].mxu1  ;;  %v1144_v16 = vmax.f32 %v1108_v7, 0.0 }
 0x383   :  { %v1103_v15 = vadd.f32 %v3269_v22, %v1102_v14  ;;  %v1142_v18 = vmax.f32 %v1100_v11, 0.0  ;;  %v2870_v22 = vld [vmem:[#allocation2] ss:$8 sps:$4 sm:$0xff]  }
 0x384   :  { %v1145_v17 = vmax.f32 %v1111_v13, 0.0  ;;  %2599 = vmatpush3.bf16.msra.mxu1 %v2852_v21 }
 0x385   :  { %v1143_v19 = vmax.f32 %v1103_v15, 0.0  ;;  %2600 = vmatprep.subr.bf16.mxu1 %v2853_v25 }
 0x386   :  { %v1161_v24 = vpack.c.bf16 %v1145_v17, %v1144_v16 }
 0x387   :  { %v1160_v20 = vpack.c.bf16 %v1143_v19, %v1142_v18 }
 0x388   :  { %2601 = vmatpush3.bf16.msra.mxu1 %v2853_v25 }
 0x389   :  { %2312 = vmatprep.subr.bf16.mxu0 %v1160_v20  ;;  %2602 = vmatprep.subr.bf16.mxu1 %v2854_v26 }
 0x38a   :  { %2313 = vmatpush3.bf16.msra.mxu0 %v3295_v63  ;;  %v2873_v63 = vld [vmem:[#allocation2 + $0x24] ss:$8 sps:$4 sm:$0xff]  }
 0x38b   :  { %2314 = vmatprep.subr.bf16.mxu0 %v1161_v24 }
 0x38c   :  { %2603 = vmatpush3.bf16.msra.mxu1 %v2854_v26 }
 0x38e   :  { %2315 = vmatpush3.bf16.msra.mxu0 %v3293_v62  ;;  %v2877_v62 = vld [vmem:[#allocation2 + $0x44] ss:$8 sps:$4 sm:$0xff]  }
 0x391   :  { %1195 = vmatmul.mubr.bf16.vlgmr.msra.gmra.mrb[64].mxu0 %v2870_v22 }
 0x392   :  { %1202 = vmatprep.mubr.bf16.mxu0 %v2871_v46 }
 0x399   :  { %1203 = vmatmul.mubr.bf16.gmra.mrb[68].mxu0 %v2872_v27 }
 0x39a   :  { %1210 = vmatprep.mubr.bf16.mxu0 %v2873_v63 }
 0x3a1   :  { %1211 = vmatmul.mubr.bf16.gmra.mrb[72].mxu0 %v2874_v28 }
 0x3a2   :  { %1218 = vmatprep.mubr.bf16.mxu0 %v2875_v43 }
 0x3a9   :  { %1219 = vmatmul.mubr.bf16.gmra.mrb[76].mxu0 %v2876_v47 }
 0x3aa   :  { %1226 = vmatprep.mubr.bf16.mxu0 %v2877_v62 }
 0x3b1   :  { %1227 = vmatmul.mubr.bf16.gmra.mrb[80].mxu0 %v3159_v29  ;;  %v2855_v29 = vld [vmem:[#allocation8 + $0x40] ss:$8 sps:$4 sm:$0xff]  }
 0x3b2   :  { %1234 = vmatprep.mubr.bf16.mxu0 %v3161_v30  ;;  %2604 = vmatprep.subr.bf16.mxu1 %v2855_v29  ;;  %v2856_v30 = vld [vmem:[#allocation8 + $0x50] ss:$8 sps:$4 sm:$0xff]  }
 0x3b3   :  { %2605 = vmatpush3.bf16.msra.mxu1 %v2855_v29 }
 0x3b4   :  { %2606 = vmatprep.subr.bf16.mxu1 %v2856_v30 }
 0x3b7   :  { %2607 = vmatpush3.bf16.msra.mxu1 %v2856_v30 }
 0x3b9   :  { %1235 = vmatmul.mubr.bf16.gmra.mrb[84].mxu0 %v3165_v31  ;;  %v2857_v31 = vld [vmem:[#allocation8 + $0x60] ss:$8 sps:$4 sm:$0xff]  }
 0x3ba   :  { %1242 = vmatprep.mubr.bf16.mxu0 %v3167_v32  ;;  %2608 = vmatprep.subr.bf16.mxu1 %v2857_v31  ;;  %v2858_v32 = vld [vmem:[#allocation8 + $0x70] ss:$8 sps:$4 sm:$0xff]  }
 0x3bb   :  { %2609 = vmatpush3.bf16.msra.mxu1 %v2857_v31 }
 0x3bc   :  { %2610 = vmatprep.subr.bf16.mxu1 %v2858_v32 }
 0x3bf   :  { %2611 = vmatpush3.bf16.msra.mxu1 %v2858_v32 }
 0x3c1   :  { %1243 = vmatmul.mubr.bf16.gmra.mrb[88].mxu0 %v3171_v33 }
 0x3c2   :  { %1250 = vmatprep.mubr.bf16.mxu0 %v3173_v34  ;;  %v2859_v34 = vld [vmem:[#allocation8 + $0x4] ss:$8 sps:$4 sm:$0xff]  }
 0x3c3   :  { %2644 = vmatprep.subr.bf16.mxu1 %v2859_v34 }
 0x3c9   :  { %1251 = vmatmul.mubr.bf16.gmra.mrb[92].mxu0 %v3177_v35 }
 0x3ca   :  { %1258 = vmatprep.mubr.bf16.mxu0 %v3179_v36 }
 0x3d1   :  { %1259 = vmatmul.mubr.bf16.gmra.mrb[96].mxu0 %v3183_v37 }
 0x3d2   :  { %1266 = vmatprep.mubr.bf16.mxu0 %v3185_v38 }
 0x3d9   :  { %1267 = vmatmul.mubr.bf16.gmra.mrb[100].mxu0 %v3189_v39 }
 0x3da   :  { %1274 = vmatprep.mubr.bf16.mxu0 %v3191_v40 }
 0x3e1   :  { %1275 = vmatmul.mubr.bf16.gmra.mrb[104].mxu0 %v3195_v41 }
 0x3e2   :  { %1282 = vmatprep.mubr.bf16.mxu0 %v3197_v42 }
 0x3e9   :  { %1283 = vmatmul.mubr.bf16.gmra.mrb[108].mxu0 %v3201_v44 }
 0x3ea   :  { %1290 = vmatprep.mubr.bf16.mxu0 %v3203_v45 }
 0x3f1   :  { %1291 = vmatmul.mubr.bf16.gmra.mrb[112].mxu0 %v3207_v48 }
 0x3f2   :  { %1298 = vmatprep.mubr.bf16.mxu0 %v3209_v49 }
 0x3f9   :  { %1299 = vmatmul.mubr.bf16.gmra.mrb[116].mxu0 %v3213_v51 }
 0x3fa   :  { %1306 = vmatprep.mubr.bf16.mxu0 %v3215_v52  ;;  %v2860_v52 = vld [vmem:[#allocation8 + $0x14] ss:$8 sps:$4 sm:$0xff]  }
 0x401   :  { %1307 = vmatmul.mubr.bf16.gmra.mrb[120].mxu0 %v3219_v53 }
 0x402   :  { %1314 = vmatprep.mubr.bf16.mxu0 %v3221_v54 }
 0x409   :  { %1315 = vmatmul.mubr.bf16.gmra.mrb[124].mxu0 %v3225_v55 }
 0x464   :  { %v2316_v33 = vpop.f32.mrb[64].mxu0 }
 0x465   :  { %v2317_v35 = vpop.f32.mrb[65].mxu0 }
 0x466   :  { %v2318_v36 = vadd.f32 %v2317_v35, %v2316_v33  ;;  %v2319_v37 = vpop.f32.mrb[66].mxu0 }
 0x467   :  { %v2320_v38 = vpop.f32.mrb[67].mxu0 }
 0x468   :  { %v2321_v39 = vadd.f32 %v2320_v38, %v2319_v37 }
 0x46a   :  { %v1323_v40 = vpack.c.bf16 %v2321_v39, %v2318_v36 }
 0x46c   :  { %v2322_v41 = vpop.f32.mrb[68].mxu0  ;;  %2612 = vmatprep.mubr.bf16.mxu1 %v1323_v40 }
 0x46d   :  { %v2323_v42 = vpop.f32.mrb[69].mxu0 }
 0x46e   :  { %v2324_v44 = vadd.f32 %v2323_v42, %v2322_v41  ;;  %v2325_v45 = vpop.f32.mrb[70].mxu0 }
 0x46f   :  { %v2326_v48 = vpop.f32.mrb[71].mxu0 }
 0x470   :  { %v2327_v49 = vadd.f32 %v2326_v48, %v2325_v45 }
 0x472   :  { %v1324_v51 = vpack.c.bf16 %v2327_v49, %v2324_v44 }
 0x474   :  { %v2328_v53 = vpop.f32.mrb[72].mxu0  ;;  %2613 = vmatmul.mubr.bf16.vlgmr.msra.gmra.mrb[64].mxu1 %v1324_v51 }
 0x475   :  { %v2329_v54 = vpop.f32.mrb[73].mxu0  ;;  %2645 = vmatpush3.bf16.msra.mxu1 %v2859_v34 }
 0x476   :  { %v2330_v55 = vadd.f32 %v2329_v54, %v2328_v53  ;;  %v2331_v59 = vpop.f32.mrb[74].mxu0  ;;  %2646 = vmatprep.subr.bf16.mxu1 %v2860_v52 }
 0x477   :  { %v2332_v50 = vpop.f32.mrb[75].mxu0 }
 0x478   :  { %v2333_v56 = vadd.f32 %v2332_v50, %v2331_v59 }
 0x479   :  { %2647 = vmatpush3.bf16.msra.mxu1 %v2860_v52 }
 0x47a   :  { %v1325_v57 = vpack.c.bf16 %v2333_v56, %v2330_v55  ;;  %2648 = vmatprep.subr.bf16.mxu1 %v2861_v58 }
 0x47c   :  { %v2334_v61 = vpop.f32.mrb[76].mxu0  ;;  %2616 = vmatprep.mubr.bf16.mxu1 %v1325_v57 }
 0x47d   :  { %v2335_v0 = vpop.f32.mrb[77].mxu0  ;;  %2649 = vmatpush3.bf16.msra.mxu1 %v2861_v58 }
 0x47e   :  { %v2336_v1 = vadd.f32 %v2335_v0, %v2334_v61  ;;  %v2337_v2 = vpop.f32.mrb[78].mxu0  ;;  %2650 = vmatprep.subr.bf16.mxu1 %v2862_v60 }
 0x47f   :  { %v2338_v4 = vpop.f32.mrb[79].mxu0 }
 0x480   :  { %v2339_v5 = vadd.f32 %v2338_v4, %v2337_v2 }
 0x481   :  { %2651 = vmatpush3.bf16.msra.mxu1 %v2862_v60 }
 0x482   :  { %v1326_v9 = vpack.c.bf16 %v2339_v5, %v2336_v1  ;;  %2652 = vmatprep.subr.bf16.mxu1 %v2863_v3 }
 0x484   :  { %v2340_v8 = vpop.f32.mrb[80].mxu0  ;;  %2617 = vmatmul.mubr.bf16.gmra.mrb[68].mxu1 %v1326_v9  ;;  %v2865_v9 = vld [vmem:[#allocation8 + $0x64] ss:$8 sps:$4 sm:$0xff]  }
 0x485   :  { %v2341_v7 = vpop.f32.mrb[81].mxu0  ;;  %2653 = vmatpush3.bf16.msra.mxu1 %v2863_v3 }
 0x486   :  { %v2342_v10 = vadd.f32 %v2341_v7, %v2340_v8  ;;  %v2343_v11 = vpop.f32.mrb[82].mxu0  ;;  %2654 = vmatprep.subr.bf16.mxu1 %v2864_v6  ;;  %v2866_v7 = vld [vmem:[#allocation8 + $0x74] ss:$8 sps:$4 sm:$0xff]  }
 0x487   :  { %v2344_v12 = vpop.f32.mrb[83].mxu0 }
 0x488   :  { %v2345_v13 = vadd.f32 %v2344_v12, %v2343_v11 }
 0x489   :  { %2655 = vmatpush3.bf16.msra.mxu1 %v2864_v6 }
 0x48a   :  { %v1327_v14 = vpack.c.bf16 %v2345_v13, %v2342_v10  ;;  %2656 = vmatprep.subr.bf16.mxu1 %v2865_v9 }
 0x48c   :  { %v2346_v15 = vpop.f32.mrb[84].mxu0  ;;  %2620 = vmatprep.mubr.bf16.mxu1 %v1327_v14 }
 0x48d   :  { %v2347_v16 = vpop.f32.mrb[85].mxu0  ;;  %2657 = vmatpush3.bf16.msra.mxu1 %v2865_v9 }
 0x48e   :  { %v2348_v17 = vadd.f32 %v2347_v16, %v2346_v15  ;;  %v2349_v18 = vpop.f32.mrb[86].mxu0  ;;  %2658 = vmatprep.subr.bf16.mxu1 %v2866_v7 }
 0x48f   :  { %v2350_v19 = vpop.f32.mrb[87].mxu0 }
 0x490   :  { %v2351_v24 = vadd.f32 %v2350_v19, %v2349_v18 }
 0x491   :  { %2659 = vmatpush3.bf16.msra.mxu1 %v2866_v7 }
 0x492   :  { %v1328_v20 = vpack.c.bf16 %v2351_v24, %v2348_v17 }
 0x494   :  { %v2352_v23 = vpop.f32.mrb[88].mxu0  ;;  %2621 = vmatmul.mubr.bf16.gmra.mrb[72].mxu1 %v1328_v20 }
 0x495   :  { %v2353_v21 = vpop.f32.mrb[89].mxu0 }
 0x496   :  { %v2354_v25 = vadd.f32 %v2353_v21, %v2352_v23  ;;  %v2355_v22 = vpop.f32.mrb[90].mxu0 }
 0x497   :  { %v2356_v26 = vpop.f32.mrb[91].mxu0 }
 0x498   :  { %v2357_v46 = vadd.f32 %v2356_v26, %v2355_v22 }
 0x49a   :  { %v1329_v27 = vpack.c.bf16 %v2357_v46, %v2354_v25 }
 0x49c   :  { %v2358_v63 = vpop.f32.mrb[92].mxu0  ;;  %2624 = vmatprep.mubr.bf16.mxu1 %v1329_v27 }
 0x49d   :  { %v2359_v28 = vpop.f32.mrb[93].mxu0 }
 0x49e   :  { %v2360_v43 = vadd.f32 %v2359_v28, %v2358_v63  ;;  %v2361_v47 = vpop.f32.mrb[94].mxu0  ;;  %v3344_v28 = vld [vmem:[%s3471_s5] ss:$0 sm:$0xff] }
 0x49f   :  { %v2362_v62 = vpop.f32.mrb[95].mxu0 }
 0x4a0   :  { %v2363_v29 = vadd.f32 %v2362_v62, %v2361_v47 }
 0x4a2   :  { %v1330_v30 = vpack.c.bf16 %v2363_v29, %v2360_v43 }
 0x4a4   :  { %v2364_v31 = vpop.f32.mrb[96].mxu0  ;;  %2625 = vmatmul.mubr.bf16.gmra.mrb[76].mxu1 %v1330_v30 }
 0x4a5   :  { %v2365_v32 = vpop.f32.mrb[97].mxu0 }
 0x4a6   :  { %v2366_v33 = vadd.f32 %v2365_v32, %v2364_v31  ;;  %v2367_v34 = vpop.f32.mrb[98].mxu0 }
 0x4a7   :  { %v2368_v35 = vpop.f32.mrb[99].mxu0 }
 0x4a8   :  { %v2369_v36 = vadd.f32 %v2368_v35, %v2367_v34 }
 0x4aa   :  { %v1331_v37 = vpack.c.bf16 %v2369_v36, %v2366_v33 }
 0x4ac   :  { %v2370_v38 = vpop.f32.mrb[100].mxu0  ;;  %2628 = vmatprep.mubr.bf16.mxu1 %v1331_v37 }
 0x4ad   :  { %v2371_v39 = vpop.f32.mrb[101].mxu0 }
 0x4ae   :  { %v2372_v40 = vadd.f32 %v2371_v39, %v2370_v38  ;;  %v2373_v41 = vpop.f32.mrb[102].mxu0 }
 0x4af   :  { %v2374_v42 = vpop.f32.mrb[103].mxu0 }
 0x4b0   :  { %v2375_v44 = vadd.f32 %v2374_v42, %v2373_v41 }
 0x4b2   :  { %v1332_v45 = vpack.c.bf16 %v2375_v44, %v2372_v40 }
 0x4b4   :  { %2629 = vmatmul.mubr.bf16.gmra.mrb[80].mxu1 %v1332_v45  ;;  %v2376_v48 = vpop.f32.mrb[104].mxu0 }
 0x4b5   :  { %v2377_v49 = vpop.f32.mrb[105].mxu0 }
 0x4b6   :  { %v2378_v51 = vadd.f32 %v2377_v49, %v2376_v48  ;;  %v2379_v52 = vpop.f32.mrb[106].mxu0 }
 0x4b7   :  { %v2380_v53 = vpop.f32.mrb[107].mxu0 }
 0x4b8   :  { %v2381_v54 = vadd.f32 %v2380_v53, %v2379_v52 }
 0x4ba   :  { %v1333_v55 = vpack.c.bf16 %v2381_v54, %v2378_v51 }
 0x4bc   :  { %v2382_v59 = vpop.f32.mrb[108].mxu0  ;;  %2632 = vmatprep.mubr.bf16.mxu1 %v1333_v55 }
 0x4bd   :  { %v2383_v58 = vpop.f32.mrb[109].mxu0 }
 0x4be   :  { %v2384_v50 = vadd.f32 %v2383_v58, %v2382_v59  ;;  %v2385_v56 = vpop.f32.mrb[110].mxu0 }
 0x4bf   :  { %v2386_v57 = vpop.f32.mrb[111].mxu0 }
 0x4c0   :  { %v2387_v60 = vadd.f32 %v2386_v57, %v2385_v56 }
 0x4c2   :  { %v1334_v61 = vpack.c.bf16 %v2387_v60, %v2384_v50 }
 0x4c4   :  { %2633 = vmatmul.mubr.bf16.gmra.mrb[84].mxu1 %v1334_v61  ;;  %v2388_v0 = vpop.f32.mrb[112].mxu0 }
 0x4c5   :  { %v2389_v1 = vpop.f32.mrb[113].mxu0 }
 0x4c6   :  { %v2390_v2 = vadd.f32 %v2389_v1, %v2388_v0  ;;  %v2391_v3 = vpop.f32.mrb[114].mxu0 }
 0x4c7   :  { %v2392_v4 = vpop.f32.mrb[115].mxu0 }
 0x4c8   :  { %v2393_v5 = vadd.f32 %v2392_v4, %v2391_v3 }
 0x4ca   :  { %v1335_v6 = vpack.c.bf16 %v2393_v5, %v2390_v2 }
 0x4cc   :  { %v2394_v8 = vpop.f32.mrb[116].mxu0  ;;  %2636 = vmatprep.mubr.bf16.mxu1 %v1335_v6 }
 0x4cd   :  { %v2395_v10 = vpop.f32.mrb[117].mxu0 }
 0x4ce   :  { %v2396_v11 = vadd.f32 %v2395_v10, %v2394_v8  ;;  %v2397_v12 = vpop.f32.mrb[118].mxu0 }
 0x4cf   :  { %v2398_v13 = vpop.f32.mrb[119].mxu0 }
 0x4d0   :  { %v2399_v14 = vadd.f32 %v2398_v13, %v2397_v12 }
 0x4d2   :  { %v1336_v15 = vpack.c.bf16 %v2399_v14, %v2396_v11 }
 0x4d4   :  { %2637 = vmatmul.mubr.bf16.gmra.mrb[88].mxu1 %v1336_v15  ;;  %v2400_v16 = vpop.f32.mrb[120].mxu0 }
 0x4d5   :  { %v2401_v17 = vpop.f32.mrb[121].mxu0 }
 0x4d6   :  { %v2402_v18 = vadd.f32 %v2401_v17, %v2400_v16  ;;  %v2403_v19 = vpop.f32.mrb[122].mxu0 }
 0x4d7   :  { %v2404_v24 = vpop.f32.mrb[123].mxu0 }
 0x4d8   :  { %v2405_v20 = vadd.f32 %v2404_v24, %v2403_v19 }
 0x4da   :  { %v1337_v23 = vpack.c.bf16 %v2405_v20, %v2402_v18 }
 0x4dc   :  { %v2406_v21 = vpop.f32.mrb[124].mxu0  ;;  %2640 = vmatprep.mubr.bf16.mxu1 %v1337_v23 }
 0x4dd   :  { %v2407_v25 = vpop.f32.mrb[125].mxu0 }
 0x4de   :  { %v2408_v22 = vadd.f32 %v2407_v25, %v2406_v21  ;;  %v2409_v26 = vpop.f32.mrb[126].mxu0 }
 0x4df   :  { %v2410_v46 = vpop.f32.mrb[127].mxu0 }
 0x4e0   :  { %v2411_v27 = vadd.f32 %v2410_v46, %v2409_v26 }
 0x4e2   :  { %v1338_v63 = vpack.c.bf16 %v2411_v27, %v2408_v22 }
 0x4e4   :  { %2641 = vmatmul.mubr.bf16.gmra.mrb[92].mxu1 %v1338_v63 }
 0x547   :  { %v2614_v43 = vpop.f32.mrb[64].mxu1 }
 0x548   :  { %v1453_v47 = vadd.f32 %v2614_v43, %v3344_v28  ;;  %v1444_v62 = vpop.f32.mrb[65].mxu1 }
 0x549   :  { %v1445_v29 = vadd.f32 %v3344_v28, %v1444_v62  ;;  %v2615_v30 = vpop.f32.mrb[66].mxu1 }
 0x54a   :  { %v1456_v31 = vadd.f32 %v2615_v30, %v3344_v28  ;;  %v1447_v32 = vpop.f32.mrb[67].mxu1  ;;  %v1573_v34 = vmax.f32 %v1453_v47, 0.0 }
 0x54b   :  { %v1448_v33 = vadd.f32 %v3344_v28, %v1447_v32  ;;  %v1571_v36 = vmax.f32 %v1445_v29, 0.0 }
 0x54c   :  { %v1574_v35 = vmax.f32 %v1456_v31, 0.0 }
 0x54d   :  { %v1572_v37 = vmax.f32 %v1448_v33, 0.0 }
 0x54e   :  { %v1604_v38 = vpack.c.bf16 %v1574_v35, %v1573_v34 }
 0x54f   :  { %v1603_v39 = vpack.c.bf16 %v1572_v37, %v1571_v36 }
 0x551   :  { %2660 = vmatprep.mubr.bf16.mxu1 %v1603_v39 }
 0x552   :  { %2661 = vmatmul.mubr.bf16.vlgmr.msra.gmra.mrb[96].mxu1 %v1604_v38 }
 0x557   :  { %v2618_v40 = vpop.f32.mrb[68].mxu1 }
 0x558   :  { %v1469_v41 = vadd.f32 %v2618_v40, %v3344_v28  ;;  %v1460_v42 = vpop.f32.mrb[69].mxu1 }
 0x559   :  { %v1461_v44 = vadd.f32 %v3344_v28, %v1460_v42  ;;  %v2619_v45 = vpop.f32.mrb[70].mxu1 }
 0x55a   :  { %v1472_v48 = vadd.f32 %v2619_v45, %v3344_v28  ;;  %v1463_v49 = vpop.f32.mrb[71].mxu1  ;;  %v1577_v52 = vmax.f32 %v1469_v41, 0.0 }
 0x55b   :  { %v1464_v51 = vadd.f32 %v3344_v28, %v1463_v49  ;;  %v1575_v54 = vmax.f32 %v1461_v44, 0.0 }
 0x55c   :  { %v1578_v53 = vmax.f32 %v1472_v48, 0.0 }
 0x55d   :  { %v1576_v55 = vmax.f32 %v1464_v51, 0.0 }
 0x55e   :  { %v1606_v59 = vpack.c.bf16 %v1578_v53, %v1577_v52 }
 0x55f   :  { %v1605_v58 = vpack.c.bf16 %v1576_v55, %v1575_v54 }
 0x561   :  { %2664 = vmatprep.mubr.bf16.mxu1 %v1605_v58 }
 0x562   :  { %2665 = vmatmul.mubr.bf16.gmra.mrb[100].mxu1 %v1606_v59 }
 0x567   :  { %v2622_v50 = vpop.f32.mrb[72].mxu1 }
 0x568   :  { %v1485_v56 = vadd.f32 %v2622_v50, %v3344_v28  ;;  %v1476_v57 = vpop.f32.mrb[73].mxu1 }
 0x569   :  { %v1477_v60 = vadd.f32 %v3344_v28, %v1476_v57  ;;  %v2623_v61 = vpop.f32.mrb[74].mxu1 }
 0x56a   :  { %v1488_v0 = vadd.f32 %v2623_v61, %v3344_v28  ;;  %v1479_v1 = vpop.f32.mrb[75].mxu1  ;;  %v1581_v3 = vmax.f32 %v1485_v56, 0.0 }
 0x56b   :  { %v1480_v2 = vadd.f32 %v3344_v28, %v1479_v1  ;;  %v1579_v5 = vmax.f32 %v1477_v60, 0.0 }
 0x56c   :  { %v1582_v4 = vmax.f32 %v1488_v0, 0.0 }
 0x56d   :  { %v1580_v9 = vmax.f32 %v1480_v2, 0.0 }
 0x56e   :  { %v1608_v6 = vpack.c.bf16 %v1582_v4, %v1581_v3 }
 0x56f   :  { %v1607_v8 = vpack.c.bf16 %v1580_v9, %v1579_v5 }
 0x571   :  { %2668 = vmatprep.mubr.bf16.mxu1 %v1607_v8 }
 0x572   :  { %2669 = vmatmul.mubr.bf16.gmra.mrb[104].mxu1 %v1608_v6 }
 0x577   :  { %v2626_v7 = vpop.f32.mrb[76].mxu1 }
 0x578   :  { %v1501_v10 = vadd.f32 %v2626_v7, %v3344_v28  ;;  %v1492_v11 = vpop.f32.mrb[77].mxu1 }
 0x579   :  { %v1493_v12 = vadd.f32 %v3344_v28, %v1492_v11  ;;  %v2627_v13 = vpop.f32.mrb[78].mxu1 }
 0x57a   :  { %v1504_v14 = vadd.f32 %v2627_v13, %v3344_v28  ;;  %v1495_v15 = vpop.f32.mrb[79].mxu1  ;;  %v1585_v17 = vmax.f32 %v1501_v10, 0.0 }
 0x57b   :  { %v1496_v16 = vadd.f32 %v3344_v28, %v1495_v15  ;;  %v1583_v19 = vmax.f32 %v1493_v12, 0.0 }
 0x57c   :  { %v1586_v18 = vmax.f32 %v1504_v14, 0.0 }
 0x57d   :  { %v1584_v24 = vmax.f32 %v1496_v16, 0.0  ;;  %v2869_v16 = vld [vmem:[%s3472_s6 + $0x4] ss:$8 sps:$4 sm:$0xff]  }
 0x57e   :  { %v1610_v20 = vpack.c.bf16 %v1586_v18, %v1585_v17  ;;  %1911 = vmatprep.mubr.bf16.mxu0 %v2869_v16  ;;  %v3384_v18 = vld [vmem:[%s3471_s5 + $0x1] ss:$0 sm:$0xff] }
 0x57f   :  { %v1609_v23 = vpack.c.bf16 %v1584_v24, %v1583_v19  ;;  %v1934_v19 = vld [vmem:[#allocation10] sm:$0xff] }
 0x581   :  { %2672 = vmatprep.mubr.bf16.mxu1 %v1609_v23  ;;  %v1935_v23 = vld [vmem:[#allocation10 + $0x8] sm:$0xff] }
 0x582   :  { %2673 = vmatmul.mubr.bf16.gmra.mrb[108].mxu1 %v1610_v20  ;;  %v3027_v20 = vmov 0  }
 0x583   :  { %2770 = vset.pattern.permute.xlu0 %v3027_v20 }
 0x587   :  { %v2630_v21 = vpop.f32.mrb[80].mxu1 }
 0x588   :  { %v1517_v25 = vadd.f32 %v2630_v21, %v3344_v28  ;;  %v1508_v22 = vpop.f32.mrb[81].mxu1  ;;  %v1936_v21 = vld [vmem:[#allocation10 + $0x10] sm:$0xff] }
 0x589   :  { %v1509_v26 = vadd.f32 %v3344_v28, %v1508_v22  ;;  %v2631_v46 = vpop.f32.mrb[82].mxu1 }
 0x58a   :  { %v1520_v27 = vadd.f32 %v2631_v46, %v3344_v28  ;;  %v1511_v63 = vpop.f32.mrb[83].mxu1  ;;  %v1589_v47 = vmax.f32 %v1517_v25, 0.0  ;;  %v1937_v25 = vld [vmem:[#allocation10 + $0x18] sm:$0xff] }
 0x58b   :  { %v1512_v43 = vadd.f32 %v3344_v28, %v1511_v63  ;;  %v1587_v29 = vmax.f32 %v1509_v26, 0.0  ;;  %v2727_v26 = vpack.c.bf16 %v1935_v23, %v1934_v19  ;;  %v2731_v46 = vpack.c.bf16 %v1937_v25, %v1936_v21 }
 0x58c   :  { %v1590_v62 = vmax.f32 %v1520_v27, 0.0 }
 0x58d   :  { %v1588_v30 = vmax.f32 %v1512_v43, 0.0  ;;  %2728 = vmatprep.subr.bf16.mxu1 %v2727_v26 }
 0x58e   :  { %v1612_v31 = vpack.c.bf16 %v1590_v62, %v1589_v47  ;;  %v1921_v47 = vld [vmem:[%s3473_s7 + $0x8] sm:$0xff]  ;;  %v1938_v62 = vld [vmem:[#allocation10 + $0x20] sm:$0xff]  ;;  %2730 = vmatpush3.bf16.msra.mxu1 %v2727_v26 }
 0x58f   :  { %v1611_v32 = vpack.c.bf16 %v1588_v30, %v1587_v29  ;;  %v1939_v29 = vld [vmem:[#allocation10 + $0x28] sm:$0xff]  ;;  %2732 = vmatprep.subr.bf16.mxu1 %v2731_v46 }
 0x591   :  { %2676 = vmatprep.mubr.bf16.mxu1 %v1611_v32 }
 0x592   :  { %2677 = vmatmul.mubr.bf16.gmra.mrb[112].mxu1 %v1612_v31 }
 0x593   :  { %2734 = vmatpush3.bf16.msra.mxu1 %v2731_v46 }
 0x597   :  { %v2634_v33 = vpop.f32.mrb[84].mxu1 }
 0x598   :  { %v1533_v34 = vadd.f32 %v2634_v33, %v3344_v28  ;;  %v1524_v35 = vpop.f32.mrb[85].mxu1 }
 0x599   :  { %v1525_v36 = vadd.f32 %v3344_v28, %v1524_v35  ;;  %v2635_v37 = vpop.f32.mrb[86].mxu1  ;;  %v1940_v35 = vld [vmem:[#allocation10 + $0x30] sm:$0xff] }
 0x59a   :  { %v1536_v38 = vadd.f32 %v2635_v37, %v3344_v28  ;;  %v1527_v39 = vpop.f32.mrb[87].mxu1  ;;  %v1593_v41 = vmax.f32 %v1533_v34, 0.0  ;;  %v2735_v34 = vpack.c.bf16 %v1939_v29, %v1938_v62 }
 0x59b   :  { %v1528_v40 = vadd.f32 %v3344_v28, %v1527_v39  ;;  %v1591_v44 = vmax.f32 %v1525_v36, 0.0  ;;  %v1941_v36 = vld [vmem:[#allocation10 + $0x38] sm:$0xff]  ;;  %v1943_v39 = vld [vmem:[#allocation10 + $0x48] sm:$0xff] }
 0x59c   :  { %v1594_v42 = vmax.f32 %v1536_v38, 0.0  ;;  %2736 = vmatprep.subr.bf16.mxu1 %v2735_v34  ;;  %v2739_v37 = vpack.c.bf16 %v1941_v36, %v1940_v35  ;;  %v1942_v38 = vld [vmem:[#allocation10 + $0x40] sm:$0xff] }
 0x59d   :  { %v1592_v45 = vmax.f32 %v1528_v40, 0.0  ;;  %2738 = vmatpush3.bf16.msra.mxu1 %v2735_v34  ;;  %v2743_v40 = vpack.c.bf16 %v1943_v39, %v1942_v38 }
 0x59e   :  { %v1614_v48 = vpack.c.bf16 %v1594_v42, %v1593_v41  ;;  %2740 = vmatprep.subr.bf16.mxu1 %v2739_v37  ;;  %v1944_v41 = vld [vmem:[#allocation10 + $0x50] sm:$0xff]  ;;  %v1945_v42 = vld [vmem:[#allocation10 + $0x58] sm:$0xff] }
 0x59f   :  { %v1613_v49 = vpack.c.bf16 %v1592_v45, %v1591_v44 }
 0x5a1   :  { %2680 = vmatprep.mubr.bf16.mxu1 %v1613_v49  ;;  %2742 = vmatpush3.bf16.msra.mxu1 %v2739_v37  ;;  %v2747_v49 = vpack.c.bf16 %v1945_v42, %v1944_v41 }
 0x5a2   :  { %2681 = vmatmul.mubr.bf16.gmra.mrb[116].mxu1 %v1614_v48  ;;  %2744 = vmatprep.subr.bf16.mxu1 %v2743_v40 }
 0x5a5   :  { %2746 = vmatpush3.bf16.msra.mxu1 %v2743_v40 }
 0x5a6   :  { %2748 = vmatprep.subr.bf16.mxu1 %v2747_v49 }
 0x5a7   :  { %v2638_v51 = vpop.f32.mrb[88].mxu1 }
 0x5a8   :  { %v1549_v52 = vadd.f32 %v2638_v51, %v3344_v28  ;;  %v1540_v53 = vpop.f32.mrb[89].mxu1 }
 0x5a9   :  { %v1541_v54 = vadd.f32 %v3344_v28, %v1540_v53  ;;  %v2639_v55 = vpop.f32.mrb[90].mxu1  ;;  %2750 = vmatpush3.bf16.msra.mxu1 %v2747_v49 }
 0x5aa   :  { %v1552_v59 = vadd.f32 %v2639_v55, %v3344_v28  ;;  %v1543_v58 = vpop.f32.mrb[91].mxu1  ;;  %v1597_v56 = vmax.f32 %v1549_v52, 0.0  ;;  %v1947_v55 = vld [vmem:[#allocation10 + $0x68] sm:$0xff] }
 0x5ab   :  { %v1544_v50 = vadd.f32 %v3344_v28, %v1543_v58  ;;  %v1595_v60 = vmax.f32 %v1541_v54, 0.0  ;;  %v1946_v54 = vld [vmem:[#allocation10 + $0x60] sm:$0xff] }
 0x5ac   :  { %v1598_v57 = vmax.f32 %v1552_v59, 0.0 }
 0x5ad   :  { %v1596_v61 = vmax.f32 %v1544_v50, 0.0 }
 0x5ae   :  { %v1616_v0 = vpack.c.bf16 %v1598_v57, %v1597_v56  ;;  %v2751_v57 = vpack.c.bf16 %v1947_v55, %v1946_v54 }
 0x5af   :  { %v1615_v1 = vpack.c.bf16 %v1596_v61, %v1595_v60 }
 0x5b0   :  { %2752 = vmatprep.subr.bf16.mxu1 %v2751_v57 }
 0x5b1   :  { %2684 = vmatprep.mubr.bf16.mxu1 %v1615_v1  ;;  %2754 = vmatpush3.bf16.msra.mxu1 %v2751_v57  ;;  %v1949_v57 = vld [vmem:[#allocation10 + $0x78] sm:$0xff] }
 0x5b2   :  { %2685 = vmatmul.mubr.bf16.gmra.mrb[120].mxu1 %v1616_v0 }
 0x5b7   :  { %v2642_v2 = vpop.f32.mrb[92].mxu1 }
 0x5b8   :  { %v1565_v3 = vadd.f32 %v2642_v2, %v3344_v28  ;;  %v1556_v4 = vpop.f32.mrb[93].mxu1 }
 0x5b9   :  { %v1557_v5 = vadd.f32 %v3344_v28, %v1556_v4  ;;  %v2643_v9 = vpop.f32.mrb[94].mxu1 }
 0x5ba   :  { %v1568_v6 = vadd.f32 %v2643_v9, %v3344_v28  ;;  %v1559_v8 = vpop.f32.mrb[95].mxu1  ;;  %v1601_v10 = vmax.f32 %v1565_v3, 0.0 }
 0x5bb   :  { %v1560_v7 = vadd.f32 %v3344_v28, %v1559_v8  ;;  %v1599_v12 = vmax.f32 %v1557_v5, 0.0  ;;  %v1920_v28 = vld [vmem:[%s3473_s7] sm:$0xff] }
 0x5bc   :  { %v1602_v11 = vmax.f32 %v1568_v6, 0.0  ;;  %1924 = vperm.xlu0 %2770, %v1920_v28  }
 0x5bd   :  { %v1600_v13 = vmax.f32 %v1560_v7, 0.0 }
 0x5be   :  { %v1618_v14 = vpack.c.bf16 %v1602_v11, %v1601_v10 }
 0x5bf   :  { %v1617_v15 = vpack.c.bf16 %v1600_v13, %v1599_v12 }
 0x5c0   :  { %1929 = vperm.xlu0 %2770, %v1921_v47  }
 0x5c1   :  { %2688 = vmatprep.mubr.bf16.mxu1 %v1617_v15 }
 0x5c2   :  { %2689 = vmatmul.mubr.bf16.gmra.mrb[124].mxu1 %v1618_v14 }
 0x625   :  { %v2662_v17 = vpop.f32.mrb[96].mxu1 }
 0x626   :  { %v1724_v24 = vpop.f32.mrb[97].mxu1  ;;  %v3390_v27 = vadd.f32 %v2662_v17, %v3384_v18 }
 0x627   :  { %v2663_v22 = vpop.f32.mrb[98].mxu1  ;;  %v3399_v30 = vadd.f32 %v3384_v18, %v1724_v24 }
 0x628   :  { %v3393_v63 = vadd.f32 %v2663_v22, %v3384_v18  ;;  %v1727_v43 = vpop.f32.mrb[99].mxu1 }
 0x629   :  { %v3402_v31 = vadd.f32 %v3384_v18, %v1727_v43 }
 0x62a   :  { %v1854_v32 = vpack.c.bf16 %v3393_v63, %v3390_v27 }
 0x62b   :  { %v1853_v33 = vpack.c.bf16 %v3402_v31, %v3399_v30 }
 0x635   :  { %v2666_v44 = vpop.f32.mrb[100].mxu1 }
 0x636   :  { %v1740_v45 = vpop.f32.mrb[101].mxu1  ;;  %v1749_v51 = vadd.f32 %v2666_v44, %v3384_v18 }
 0x637   :  { %v2667_v48 = vpop.f32.mrb[102].mxu1  ;;  %v1741_v59 = vadd.f32 %v3384_v18, %v1740_v45 }
 0x638   :  { %v1752_v52 = vadd.f32 %v2667_v48, %v3384_v18  ;;  %v1743_v53 = vpop.f32.mrb[103].mxu1 }
 0x639   :  { %v1744_v58 = vadd.f32 %v3384_v18, %v1743_v53 }
 0x63a   :  { %v1856_v50 = vpack.c.bf16 %v1752_v52, %v1749_v51 }
 0x63b   :  { %v1855_v56 = vpack.c.bf16 %v1744_v58, %v1741_v59 }
 0x645   :  { %v2670_v60 = vpop.f32.mrb[104].mxu1 }
 0x646   :  { %v1756_v61 = vpop.f32.mrb[105].mxu1  ;;  %v1765_v1 = vadd.f32 %v2670_v60, %v3384_v18 }
 0x647   :  { %v2671_v0 = vpop.f32.mrb[106].mxu1  ;;  %v1757_v4 = vadd.f32 %v3384_v18, %v1756_v61  ;;  %v1925_v61 = vpop.permute.xlu0 %1924 }
 0x648   :  { %v1768_v2 = vadd.f32 %v2671_v0, %v3384_v18  ;;  %v1759_v3 = vpop.f32.mrb[107].mxu1 }
 0x649   :  { %v1760_v5 = vadd.f32 %v3384_v18, %v1759_v3 }
 0x64a   :  { %v1858_v9 = vpack.c.bf16 %v1768_v2, %v1765_v1 }
 0x64b   :  { %v1857_v6 = vpack.c.bf16 %v1760_v5, %v1757_v4 }
 0x655   :  { %v2674_v8 = vpop.f32.mrb[108].mxu1 }
 0x656   :  { %v1772_v7 = vpop.f32.mrb[109].mxu1  ;;  %v3417_v11 = vadd.f32 %v2674_v8, %v3384_v18  ;;  %v2139_v8 = vld [vmem:[%s3475_s9] ss:$0 sm:$0xff] }
 0x657   :  { %v2675_v10 = vpop.f32.mrb[110].mxu1  ;;  %v1773_v14 = vadd.f32 %v3384_v18, %v1772_v7 }
 0x658   :  { %v1784_v12 = vadd.f32 %v2675_v10, %v3384_v18  ;;  %v1775_v13 = vpop.f32.mrb[111].mxu1 }
 0x659   :  { %v1776_v15 = vadd.f32 %v3384_v18, %v1775_v13 }
 0x65a   :  { %v1860_v16 = vpack.c.bf16 %v1784_v12, %v3417_v11 }
 0x65b   :  { %v1859_v17 = vpack.c.bf16 %v1776_v15, %v1773_v14 }
 0x665   :  { %v2678_v28 = vpop.f32.mrb[112].mxu1 }
 0x666   :  { %v1788_v19 = vpop.f32.mrb[113].mxu1  ;;  %v1797_v20 = vadd.f32 %v2678_v28, %v3384_v18 }
 0x667   :  { %v2679_v24 = vpop.f32.mrb[114].mxu1  ;;  %v1789_v25 = vadd.f32 %v3384_v18, %v1788_v19 }
 0x668   :  { %v1800_v23 = vadd.f32 %v2679_v24, %v3384_v18  ;;  %v1791_v21 = vpop.f32.mrb[115].mxu1 }
 0x669   :  { %v1792_v22 = vadd.f32 %v3384_v18, %v1791_v21 }
 0x66a   :  { %v1862_v26 = vpack.c.bf16 %v1800_v23, %v1797_v20 }
 0x66b   :  { %v1861_v46 = vpack.c.bf16 %v1792_v22, %v1789_v25 }
 0x66d   :  { %2460 = vmatprep.subr.bf16.mxu0 %v1861_v46 }
 0x66e   :  { %2461 = vmatpush3.bf16.msra.mxu0 %v1853_v33 }
 0x66f   :  { %2462 = vmatprep.subr.bf16.mxu0 %v1862_v26 }
 0x672   :  { %2463 = vmatpush3.bf16.msra.mxu0 %v1854_v32 }
 0x675   :  { %v2682_v43 = vpop.f32.mrb[116].mxu1 }
 0x676   :  { %v1804_v47 = vpop.f32.mrb[117].mxu1  ;;  %v1813_v29 = vadd.f32 %v2682_v43, %v3384_v18 }
 0x677   :  { %v2683_v62 = vpop.f32.mrb[118].mxu1  ;;  %v1805_v36 = vadd.f32 %v3384_v18, %v1804_v47 }
 0x678   :  { %v1816_v34 = vadd.f32 %v2683_v62, %v3384_v18  ;;  %v1807_v35 = vpop.f32.mrb[119].mxu1 }
 0x679   :  { %v1808_v37 = vadd.f32 %v3384_v18, %v1807_v35 }
 0x67a   :  { %v1864_v38 = vpack.c.bf16 %v1816_v34, %v1813_v29 }
 0x67b   :  { %v1863_v30 = vpack.c.bf16 %v1808_v37, %v1805_v36 }
 0x67d   :  { %2464 = vmatprep.subr.bf16.mxu0 %v1863_v30 }
 0x67e   :  { %2465 = vmatpush3.bf16.msra.mxu0 %v1855_v56  ;;  %v1948_v56 = vld [vmem:[#allocation10 + $0x70] sm:$0xff] }
 0x67f   :  { %2466 = vmatprep.subr.bf16.mxu0 %v1864_v38  ;;  %v2755_v60 = vpack.c.bf16 %v1949_v57, %v1948_v56 }
 0x681   :  { %2756 = vmatprep.subr.bf16.mxu1 %v2755_v60 }
 0x682   :  { %2467 = vmatpush3.bf16.msra.mxu0 %v1856_v50  ;;  %v2867_v50 = vld [vmem:[%s3472_s6] ss:$8 sps:$4 sm:$0xff]   ;;  %2758 = vmatpush3.bf16.msra.mxu1 %v2755_v60 }
 0x685   :  { %v2686_v27 = vpop.f32.mrb[120].mxu1 }
 0x686   :  { %v1820_v63 = vpop.f32.mrb[121].mxu1  ;;  %v1829_v32 = vadd.f32 %v2686_v27, %v3384_v18 }
 0x687   :  { %v2687_v31 = vpop.f32.mrb[122].mxu1  ;;  %v1821_v40 = vadd.f32 %v3384_v18, %v1820_v63 }
 0x688   :  { %v1832_v33 = vadd.f32 %v2687_v31, %v3384_v18  ;;  %v1823_v39 = vpop.f32.mrb[123].mxu1 }
 0x689   :  { %v1824_v41 = vadd.f32 %v3384_v18, %v1823_v39 }
 0x68a   :  { %v1866_v42 = vpack.c.bf16 %v1832_v33, %v1829_v32 }
 0x68b   :  { %v1865_v44 = vpack.c.bf16 %v1824_v41, %v1821_v40 }
 0x68d   :  { %2468 = vmatprep.subr.bf16.mxu0 %v1865_v44 }
 0x68e   :  { %2469 = vmatpush3.bf16.msra.mxu0 %v1857_v6 }
 0x68f   :  { %2470 = vmatprep.subr.bf16.mxu0 %v1866_v42 }
 0x692   :  { %2471 = vmatpush3.bf16.msra.mxu0 %v1858_v9  ;;  %v1930_v9 = vpop.permute.xlu0 %1929 }
 0x695   :  { %v2690_v45 = vpop.f32.mrb[124].mxu1 }
 0x696   :  { %v1836_v48 = vpop.f32.mrb[125].mxu1  ;;  %v1845_v51 = vadd.f32 %v2690_v45, %v3384_v18 }
 0x697   :  { %v2691_v49 = vpop.f32.mrb[126].mxu1  ;;  %v1837_v54 = vadd.f32 %v3384_v18, %v1836_v48 }
 0x698   :  { %v1848_v52 = vadd.f32 %v2691_v49, %v3384_v18  ;;  %v1839_v53 = vpop.f32.mrb[127].mxu1 }
 0x699   :  { %v1840_v55 = vadd.f32 %v3384_v18, %v1839_v53 }
 0x69a   :  { %v1868_v59 = vpack.c.bf16 %v1848_v52, %v1845_v51 }
 0x69b   :  { %v1867_v58 = vpack.c.bf16 %v1840_v55, %v1837_v54 }
 0x69d   :  { %2472 = vmatprep.subr.bf16.mxu0 %v1867_v58 }
 0x69e   :  { %2473 = vmatpush3.bf16.msra.mxu0 %v1859_v17 }
 0x69f   :  { %2474 = vmatprep.subr.bf16.mxu0 %v1868_v59 }
 0x6a2   :  { %2475 = vmatpush3.bf16.msra.mxu0 %v1860_v16 }
 0x6a5   :  { %1912 = vmatmul.mubr.bf16.vlgmr.msra.gmra.mrb[128].mxu0 %v2867_v50 }
 0x778   :  { %v2476_v0 = vpop.f32.mrb[128].mxu0 }
 0x779   :  { %v2477_v1 = vpop.f32.mrb[129].mxu0 }
 0x77a   :  { %v2478_v18 = vadd.f32 %v2477_v1, %v2476_v0  ;;  %v2479_v2 = vpop.f32.mrb[130].mxu0 }
 0x77b   :  { %v2480_v3 = vpop.f32.mrb[131].mxu0 }
 0x77c   :  { %v1932_v4 = vmul.f32 %v2478_v18, %v1925_v61  ;;  %v2481_v5 = vadd.f32 %v2480_v3, %v2479_v2 }
 0x77e   :  { %v1933_v6 = vmul.f32 %v2481_v5, %v1930_v9  ;;  %2724 = vmatprep.mubr.f32.mxu1 %v1932_v4 }
 0x780   :  { %2725 = vmatmul.mubr.f32.vlgmr.msra.gmra.mrb[128].mxu1 %v1933_v6 }
 0x853   :  { %v2726_v7 = vpop.f32.mrb[128].mxu1 }
 0x854   :  { %v2029_v10 = vadd.f32 %v2726_v7, %v2139_v8  ;;  %v2023_v11 = vpop.f32.mrb[129].mxu1 }
 0x855   :  { %v2024_v12 = vadd.f32 %v2139_v8, %v2023_v11 }
 0x856   :  { %2033 = vst [vmem:[#allocation11 + $0x8] sm:$0xff] %v2029_v10 }
 0x857   :  { %2032 = vst [vmem:[#allocation11] sm:$0xff] %v2024_v12 }
 0x858   :  { %2999 = shalt.err (!%p2996_p2)
}
 0x859   :  { %s3000_s9 = scalar_lea.hbm %s3476_s10, 256 }
 0x85a   :  { %p3001_p3 = scmp.ne.s32.totalorder %s3476_s10, %s3000_s9  ;;  %p3004_p4 = scmp.lt.u32.totalorder %s3000_s9, %s3476_s10 }
 0x85c   :  { %p3006_p5 = pnand %p3004_p4, %p3001_p3 }
 0x85e   :  { %3009 = shalt.err (!%p3006_p5)
}
 0x85f   :  { %2045 = dma.vmem_to_hbm [thread:$0]  %s2040_s27, 256, %s3476_s10, [#allocation4], %s3023_s14, %s3023_s14, %s3024_s19  }
 0x860   :  { %3016 = dma.done.wait [#allocation4], 256  }
 0x861   :  { %3017 = vsyncadd [#allocation4], 4294967040 }
 0x862   :  { %2049 = vsyncpa [#allocation3], 1 }
 0x863   :  { %2050 = vsyncpa [#allocation6], 1 }
 0x864   :  { %2051 = vsyncpa [#allocation9], 1 }
 0x865   :  { %2052 = vsyncpa [#allocation4], 1 }

</bundles_post_ra>
